<compile_context>
chip_gen: v6e
topology: v6e:2x2x1
jax: 0.10.0
libtpu: 0.0.40
codegen_flags: <defaults>
</compile_context>

<pallas_src>
import math

import jax
import jax.numpy as jnp
from jax.experimental import pallas as pl
from jax.experimental.pallas import tpu as pltpu

# ---------------- model hyper-parameters (small, synthetic) ----------------
NUM_LAYERS = 2
VOCAB_SIZE = 50
VOCAB_PAD = 64          # embedding table padded to a sublane-friendly row count
MAX_SEQ_LEN = 16
NUM_HEADS = 4
D_MODEL = 32
D_FF = 64
PADDING_IDX = 0
LN_EPS = 1e-5           # assumption for the custom LayerNorm class

BATCH = 2
SEQ = 8
D_HEAD = D_MODEL // NUM_HEADS
BS = BATCH * SEQ


# --------------------------- kernel helpers ---------------------------------
def _layer_norm(x, gamma, beta):
    # x: (BS, D) f32 ; gamma/beta: (1, D)
    mean = jnp.mean(x, axis=-1, keepdims=True)
    xc = x - mean
    var = jnp.mean(xc * xc, axis=-1, keepdims=True)
    inv = jax.lax.rsqrt(var + LN_EPS)
    return xc * inv * gamma + beta


def _softmax_last(x):
    m = jnp.max(x, axis=-1, keepdims=True)
    e = jnp.exp(x - m)
    return e / jnp.sum(e, axis=-1, keepdims=True)


# ----------------------------- fused kernel ---------------------------------
def encoder_kernel(tok_ref, embed_ref, pe_ref,
                   ln1_g_ref, ln1_b_ref,
                   wqkv_ref, bqkv_ref, wo_ref, bo_ref,
                   ln2_g_ref, ln2_b_ref,
                   w1_ref, b1_ref, w2_ref, b2_ref,
                   out_ref):
    # ---- embedding lookup as a one-hot matmul (padding_idx row is zero) ----
    toks = tok_ref[...]                                            # (BS, 1) i32
    vocab_ids = jax.lax.broadcasted_iota(jnp.int32, (BS, VOCAB_PAD), 1)
    one_hot = (toks == vocab_ids).astype(jnp.float32)              # (BS, V)
    x = jnp.dot(one_hot, embed_ref[...], preferred_element_type=jnp.float32)
    x = x + pe_ref[...]                                            # + sinusoidal PE

    ln1_g = ln1_g_ref[...]; ln1_b = ln1_b_ref[...]
    ln2_g = ln2_g_ref[...]; ln2_b = ln2_b_ref[...]
    wqkv = wqkv_ref[...];   bqkv = bqkv_ref[...]
    wo = wo_ref[...];       bo = bo_ref[...]
    w1 = w1_ref[...];       b1 = b1_ref[...]
    w2 = w2_ref[...];       b2 = b2_ref[...]

    scale = 1.0 / math.sqrt(D_HEAD)

    # The PyTorch Encoder re-applies the SAME EncoderLayer instance
    # num_layers times -> unrolled here with the VMEM-resident shared weights.
    for _ in range(NUM_LAYERS):
        # ---- pre-norm 1 + multi-head self attention (mask=None, dropout=id)
        xn1 = _layer_norm(x, ln1_g, ln1_b)
        qkv = jnp.dot(xn1, wqkv, preferred_element_type=jnp.float32) + bqkv
        q = qkv[:, 0:D_MODEL].reshape(BATCH, SEQ, D_MODEL)
        k = qkv[:, D_MODEL:2 * D_MODEL].reshape(BATCH, SEQ, D_MODEL)
        v = qkv[:, 2 * D_MODEL:3 * D_MODEL].reshape(BATCH, SEQ, D_MODEL)

        att = jnp.zeros((BS, D_MODEL), jnp.float32)
        for h in range(NUM_HEADS):              # static; batched over B inside
            lo = h * D_HEAD
            hi = lo + D_HEAD
            qh = q[:, :, lo:hi]                 # (B, S, Dh)
            kh = k[:, :, lo:hi]
            vh = v[:, :, lo:hi]
            scores = jnp.einsum('bsd,btd->bst', qh, kh,
                                preferred_element_type=jnp.float32) * scale
            probs = _softmax_last(scores)       # (B, S, S)
            ctx = jnp.einsum('bst,btd->bsd', probs, vh,
                             preferred_element_type=jnp.float32)
            # concat(ctx_h) @ Wo  ==  sum_h ctx_h @ Wo[h*Dh:(h+1)*Dh, :]
            att = att + jnp.dot(ctx.reshape(BS, D_HEAD), wo[lo:hi, :],
                                preferred_element_type=jnp.float32)
        att = att + bo
        xr1 = x + att                           # dropout_1 is identity (eval)

        # ---- pre-norm 2 + position-wise FFN
        xn2 = _layer_norm(xr1, ln2_g, ln2_b)
        hid = jnp.dot(xn2, w1, preferred_element_type=jnp.float32) + b1
        hid = jnp.maximum(hid, 0.0)             # ReLU
        ffn = jnp.dot(hid, w2, preferred_element_type=jnp.float32) + b2
        x = xr1 + ffn                           # dropout_2 is identity (eval)

    # ---- lane-dense output slab: (BS, D) -> (B, S*D) via lane concatenation
    rows = []
    for b in range(BATCH):
        segs = [x[b * SEQ + s:b * SEQ + s + 1, :] for s in range(SEQ)]
        rows.append(jnp.concatenate(segs, axis=1))      # (1, S*D)
    out_ref[...] = jnp.concatenate(rows, axis=0).astype(out_ref.dtype)


# ------------------------------ wrapper --------------------------------------
@jax.jit
def encoder_forward(tokens, embed, pe, layer_params):
    """tokens: (B, S) int32 -> (B, S, D) float32."""
    B, S = tokens.shape
    toks = tokens.reshape(B * S, 1).astype(jnp.int32)
    # pad the embedding table rows to VOCAB_PAD (extra rows are zero and never
    # selected since token ids < VOCAB_SIZE)
    embed_p = jnp.zeros((VOCAB_PAD, D_MODEL), jnp.float32).at[:VOCAB_SIZE].set(embed)
    pe_tiled = jnp.tile(pe[:S], (B, 1))                  # (B*S, D), batch-major

    n_inputs = 3 + len(layer_params)
    out = pl.pallas_call(
        encoder_kernel,
        out_shape=jax.ShapeDtypeStruct((B, S * D_MODEL), jnp.float32),
        in_specs=[pl.BlockSpec(memory_space=pltpu.MemorySpace.VMEM)
                  for _ in range(n_inputs)],
        out_specs=pl.BlockSpec(memory_space=pltpu.MemorySpace.VMEM),
    )(toks, embed_p, pe_tiled, *layer_params)
    return out.reshape(B, S, D_MODEL)


# --------------------------- parameter setup ---------------------------------
def init_params(key):
    ks = jax.random.split(key, 8)
    s = 0.02

    def dense(k, din, dout):
        return jax.random.normal(k, (din, dout), jnp.float32) * s

    embed = jax.random.normal(ks[0], (VOCAB_SIZE, D_MODEL), jnp.float32) * s
    embed = embed.at[PADDING_IDX].set(0.0)    # padding_idx row is zero

    # sinusoidal positional encoding table (max_seq_len, d_model)
    pos = jnp.arange(MAX_SEQ_LEN, dtype=jnp.float32)[:, None]
    i = jnp.arange(0, D_MODEL, 2, dtype=jnp.float32)[None, :]
    angle = pos / jnp.power(10000.0, i / D_MODEL)
    pe = jnp.zeros((MAX_SEQ_LEN, D_MODEL), jnp.float32)
    pe = pe.at[:, 0::2].set(jnp.sin(angle))
    pe = pe.at[:, 1::2].set(jnp.cos(angle))

    layer = (
        jnp.ones((1, D_MODEL), jnp.float32),                 # ln1 gamma
        jnp.zeros((1, D_MODEL), jnp.float32),                # ln1 beta
        dense(ks[1], D_MODEL, 3 * D_MODEL),                  # wqkv (fused Q|K|V)
        jnp.zeros((1, 3 * D_MODEL), jnp.float32),            # bqkv
        dense(ks[2], D_MODEL, D_MODEL),                      # wo
        jnp.zeros((1, D_MODEL), jnp.float32),                # bo
        jnp.ones((1, D_MODEL), jnp.float32),                 # ln2 gamma
        jnp.zeros((1, D_MODEL), jnp.float32),                # ln2 beta
        dense(ks[3], D_MODEL, D_FF),                         # w1
        jnp.zeros((1, D_FF), jnp.float32),                   # b1
        dense(ks[4], D_FF, D_MODEL),                         # w2
        jnp.zeros((1, D_MODEL), jnp.float32),                # b2
    )
    return embed, pe, layer


# ------------------------------- main ----------------------------------------
if __name__ == "__main__":
    key = jax.random.PRNGKey(0)
    pkey, tkey = jax.random.split(key)

    embed, pe, layer_params = init_params(pkey)
    tokens = jax.random.randint(tkey, (BATCH, SEQ), 0, VOCAB_SIZE, dtype=jnp.int32)

    out = encoder_forward(tokens, embed, pe, layer_params)
    out = jax.block_until_ready(out)

    assert out.shape == (BATCH, SEQ, D_MODEL)
    assert bool(jnp.all(jnp.isfinite(out)))
    print("KERNEL_OK")
</pallas_src>

<mosaic_0001>
module attributes {stable_mosaic.version = 11 : i64} {
  func.func @encoder_kernel(%arg0: memref<16x1xi32, #tpu.memory_space<vmem>>, %arg1: memref<64x32xf32, #tpu.memory_space<vmem>>, %arg2: memref<16x32xf32, #tpu.memory_space<vmem>>, %arg3: memref<1x32xf32, #tpu.memory_space<vmem>>, %arg4: memref<1x32xf32, #tpu.memory_space<vmem>>, %arg5: memref<32x96xf32, #tpu.memory_space<vmem>>, %arg6: memref<1x96xf32, #tpu.memory_space<vmem>>, %arg7: memref<32x32xf32, #tpu.memory_space<vmem>>, %arg8: memref<1x32xf32, #tpu.memory_space<vmem>>, %arg9: memref<1x32xf32, #tpu.memory_space<vmem>>, %arg10: memref<1x32xf32, #tpu.memory_space<vmem>>, %arg11: memref<32x64xf32, #tpu.memory_space<vmem>>, %arg12: memref<1x64xf32, #tpu.memory_space<vmem>>, %arg13: memref<64x32xf32, #tpu.memory_space<vmem>>, %arg14: memref<1x32xf32, #tpu.memory_space<vmem>>, %arg15: memref<2x256xf32, #tpu.memory_space<vmem>>) attributes {dimension_semantics = [], scalar_prefetch = 0 : i64, scratch_operands = 0 : i64, tpu.core_type = #tpu.core_type<tc>} {
    %c0 = arith.constant 0 : index
    %c0_0 = arith.constant 0 : index
    %0 = vector.load %arg0[%c0, %c0_0] : memref<16x1xi32, #tpu.memory_space<vmem>>, vector<16x1xi32>
    %1 = tpu.iota {dimensions = array<i32: 1>} : vector<16x64xi32>
    %2 = vector.broadcast %0 : vector<16x1xi32> to vector<16x64xi32>
    %3 = arith.cmpi eq, %2, %1 : vector<16x64xi32>
    %4 = arith.extui %3 : vector<16x64xi1> to vector<16x64xi32>
    %5 = arith.sitofp %4 : vector<16x64xi32> to vector<16x64xf32>
    %c0_1 = arith.constant 0 : index
    %c0_2 = arith.constant 0 : index
    %6 = vector.load %arg1[%c0_1, %c0_2] : memref<64x32xf32, #tpu.memory_space<vmem>>, vector<64x32xf32>
    %cst = arith.constant dense<0.000000e+00> : vector<16x32xf32>
    %7 = tpu.matmul %5, %6, %cst {dimension_numbers = #tpu.dot_dimension_numbers<[1], [0], [0], [1], [0, 0, 1, 1], [], []>} : vector<16x64xf32>, vector<64x32xf32>, vector<16x32xf32> -> vector<16x32xf32>
    %c0_3 = arith.constant 0 : index
    %c0_4 = arith.constant 0 : index
    %8 = vector.load %arg2[%c0_3, %c0_4] : memref<16x32xf32, #tpu.memory_space<vmem>>, vector<16x32xf32>
    %9 = arith.addf %7, %8 : vector<16x32xf32>
    %c0_5 = arith.constant 0 : index
    %c0_6 = arith.constant 0 : index
    %10 = vector.load %arg3[%c0_5, %c0_6] : memref<1x32xf32, #tpu.memory_space<vmem>>, vector<1x32xf32>
    %c0_7 = arith.constant 0 : index
    %c0_8 = arith.constant 0 : index
    %11 = vector.load %arg4[%c0_7, %c0_8] : memref<1x32xf32, #tpu.memory_space<vmem>>, vector<1x32xf32>
    %c0_9 = arith.constant 0 : index
    %c0_10 = arith.constant 0 : index
    %12 = vector.load %arg9[%c0_9, %c0_10] : memref<1x32xf32, #tpu.memory_space<vmem>>, vector<1x32xf32>
    %c0_11 = arith.constant 0 : index
    %c0_12 = arith.constant 0 : index
    %13 = vector.load %arg10[%c0_11, %c0_12] : memref<1x32xf32, #tpu.memory_space<vmem>>, vector<1x32xf32>
    %c0_13 = arith.constant 0 : index
    %c0_14 = arith.constant 0 : index
    %14 = vector.load %arg5[%c0_13, %c0_14] : memref<32x96xf32, #tpu.memory_space<vmem>>, vector<32x96xf32>
    %c0_15 = arith.constant 0 : index
    %c0_16 = arith.constant 0 : index
    %15 = vector.load %arg6[%c0_15, %c0_16] : memref<1x96xf32, #tpu.memory_space<vmem>>, vector<1x96xf32>
    %c0_17 = arith.constant 0 : index
    %c0_18 = arith.constant 0 : index
    %16 = vector.load %arg7[%c0_17, %c0_18] : memref<32x32xf32, #tpu.memory_space<vmem>>, vector<32x32xf32>
    %c0_19 = arith.constant 0 : index
    %c0_20 = arith.constant 0 : index
    %17 = vector.load %arg8[%c0_19, %c0_20] : memref<1x32xf32, #tpu.memory_space<vmem>>, vector<1x32xf32>
    %c0_21 = arith.constant 0 : index
    %c0_22 = arith.constant 0 : index
    %18 = vector.load %arg11[%c0_21, %c0_22] : memref<32x64xf32, #tpu.memory_space<vmem>>, vector<32x64xf32>
    %c0_23 = arith.constant 0 : index
    %c0_24 = arith.constant 0 : index
    %19 = vector.load %arg12[%c0_23, %c0_24] : memref<1x64xf32, #tpu.memory_space<vmem>>, vector<1x64xf32>
    %c0_25 = arith.constant 0 : index
    %c0_26 = arith.constant 0 : index
    %20 = vector.load %arg13[%c0_25, %c0_26] : memref<64x32xf32, #tpu.memory_space<vmem>>, vector<64x32xf32>
    %c0_27 = arith.constant 0 : index
    %c0_28 = arith.constant 0 : index
    %21 = vector.load %arg14[%c0_27, %c0_28] : memref<1x32xf32, #tpu.memory_space<vmem>>, vector<1x32xf32>
    %cst_29 = arith.constant dense<0.000000e+00> : vector<16xf32>
    %22 = vector.multi_reduction <add>, %9, %cst_29 [1] : vector<16x32xf32> to vector<16xf32>
    %23 = vector.shape_cast %22 : vector<16xf32> to vector<16x1xf32>
    %cst_30 = arith.constant 3.200000e+01 : f32
    %24 = vector.broadcast %cst_30 : f32 to vector<16x1xf32>
    %25 = arith.divf %23, %24 : vector<16x1xf32>
    %26 = vector.broadcast %25 : vector<16x1xf32> to vector<16x32xf32>
    %27 = arith.subf %9, %26 : vector<16x32xf32>
    %28 = arith.mulf %27, %27 : vector<16x32xf32>
    %cst_31 = arith.constant dense<0.000000e+00> : vector<16xf32>
    %29 = vector.multi_reduction <add>, %28, %cst_31 [1] : vector<16x32xf32> to vector<16xf32>
    %30 = vector.shape_cast %29 : vector<16xf32> to vector<16x1xf32>
    %cst_32 = arith.constant 3.200000e+01 : f32
    %31 = vector.broadcast %cst_32 : f32 to vector<16x1xf32>
    %32 = arith.divf %30, %31 : vector<16x1xf32>
    %cst_33 = arith.constant 9.99999974E-6 : f32
    %33 = vector.broadcast %cst_33 : f32 to vector<16x1xf32>
    %34 = arith.addf %32, %33 : vector<16x1xf32>
    %35 = math.rsqrt %34 : vector<16x1xf32>
    %36 = vector.broadcast %35 : vector<16x1xf32> to vector<16x32xf32>
    %37 = arith.mulf %27, %36 : vector<16x32xf32>
    %38 = vector.broadcast %10 : vector<1x32xf32> to vector<16x32xf32>
    %39 = arith.mulf %37, %38 : vector<16x32xf32>
    %40 = vector.broadcast %11 : vector<1x32xf32> to vector<16x32xf32>
    %41 = arith.addf %39, %40 : vector<16x32xf32>
    %cst_34 = arith.constant dense<0.000000e+00> : vector<16x96xf32>
    %42 = tpu.matmul %41, %14, %cst_34 {dimension_numbers = #tpu.dot_dimension_numbers<[1], [0], [0], [1], [0, 0, 1, 1], [], []>} : vector<16x32xf32>, vector<32x96xf32>, vector<16x96xf32> -> vector<16x96xf32>
    %43 = vector.broadcast %15 : vector<1x96xf32> to vector<16x96xf32>
    %44 = arith.addf %42, %43 : vector<16x96xf32>
    %45 = vector.extract_strided_slice %44 {offsets = [0, 0], sizes = [16, 32], strides = [1, 1]} : vector<16x96xf32> to vector<16x32xf32>
    %46 = vector.shape_cast %45 : vector<16x32xf32> to vector<2x8x32xf32>
    %47 = vector.extract_strided_slice %44 {offsets = [0, 32], sizes = [16, 32], strides = [1, 1]} : vector<16x96xf32> to vector<16x32xf32>
    %48 = vector.shape_cast %47 : vector<16x32xf32> to vector<2x8x32xf32>
    %49 = vector.extract_strided_slice %44 {offsets = [0, 64], sizes = [16, 32], strides = [1, 1]} : vector<16x96xf32> to vector<16x32xf32>
    %50 = vector.shape_cast %49 : vector<16x32xf32> to vector<2x8x32xf32>
    %cst_35 = arith.constant 0.000000e+00 : f32
    %51 = vector.broadcast %cst_35 : f32 to vector<16x32xf32>
    %52 = vector.extract_strided_slice %46 {offsets = [0, 0, 0], sizes = [2, 8, 8], strides = [1, 1, 1]} : vector<2x8x32xf32> to vector<2x8x8xf32>
    %53 = vector.extract_strided_slice %48 {offsets = [0, 0, 0], sizes = [2, 8, 8], strides = [1, 1, 1]} : vector<2x8x32xf32> to vector<2x8x8xf32>
    %54 = vector.extract_strided_slice %50 {offsets = [0, 0, 0], sizes = [2, 8, 8], strides = [1, 1, 1]} : vector<2x8x32xf32> to vector<2x8x8xf32>
    "tpu.trace_start"() <{level = 10 : i32, message = "bsd,btd->bst"}> : () -> ()
    %cst_36 = arith.constant dense<0.000000e+00> : vector<2x8x8xf32>
    %55 = tpu.matmul %52, %53, %cst_36 {dimension_numbers = #tpu.dot_dimension_numbers<[2], [2], [1], [1], [0, 0, 0, 1, 1, 1], [0], [0]>} : vector<2x8x8xf32>, vector<2x8x8xf32>, vector<2x8x8xf32> -> vector<2x8x8xf32>
    "tpu.trace_stop"() : () -> ()
    %cst_37 = arith.constant 0.353553385 : f32
    %56 = vector.broadcast %cst_37 : f32 to vector<2x8x8xf32>
    %57 = arith.mulf %55, %56 : vector<2x8x8xf32>
    %cst_38 = arith.constant dense<0xFF800000> : vector<2x8xf32>
    %58 = vector.multi_reduction <maximumf>, %57, %cst_38 [2] : vector<2x8x8xf32> to vector<2x8xf32>
    %59 = vector.shape_cast %58 : vector<2x8xf32> to vector<2x8x1xf32>
    %60 = vector.broadcast %59 : vector<2x8x1xf32> to vector<2x8x8xf32>
    %61 = arith.subf %57, %60 : vector<2x8x8xf32>
    %62 = math.exp %61 : vector<2x8x8xf32>
    %cst_39 = arith.constant dense<0.000000e+00> : vector<2x8xf32>
    %63 = vector.multi_reduction <add>, %62, %cst_39 [2] : vector<2x8x8xf32> to vector<2x8xf32>
    %64 = vector.shape_cast %63 : vector<2x8xf32> to vector<2x8x1xf32>
    %65 = vector.broadcast %64 : vector<2x8x1xf32> to vector<2x8x8xf32>
    %66 = arith.divf %62, %65 : vector<2x8x8xf32>
    "tpu.trace_start"() <{level = 10 : i32, message = "bst,btd->bsd"}> : () -> ()
    %cst_40 = arith.constant dense<0.000000e+00> : vector<2x8x8xf32>
    %67 = tpu.matmul %66, %54, %cst_40 {dimension_numbers = #tpu.dot_dimension_numbers<[2], [1], [1], [2], [0, 0, 0, 1, 1, 2], [0], [0]>} : vector<2x8x8xf32>, vector<2x8x8xf32>, vector<2x8x8xf32> -> vector<2x8x8xf32>
    "tpu.trace_stop"() : () -> ()
    %68 = vector.shape_cast %67 : vector<2x8x8xf32> to vector<16x8xf32>
    %69 = vector.extract_strided_slice %16 {offsets = [0, 0], sizes = [8, 32], strides = [1, 1]} : vector<32x32xf32> to vector<8x32xf32>
    %cst_41 = arith.constant dense<0.000000e+00> : vector<16x32xf32>
    %70 = tpu.matmul %68, %69, %cst_41 {dimension_numbers = #tpu.dot_dimension_numbers<[1], [0], [0], [1], [0, 0, 1, 1], [], []>} : vector<16x8xf32>, vector<8x32xf32>, vector<16x32xf32> -> vector<16x32xf32>
    %71 = arith.addf %51, %70 : vector<16x32xf32>
    %72 = vector.extract_strided_slice %46 {offsets = [0, 0, 8], sizes = [2, 8, 8], strides = [1, 1, 1]} : vector<2x8x32xf32> to vector<2x8x8xf32>
    %73 = vector.extract_strided_slice %48 {offsets = [0, 0, 8], sizes = [2, 8, 8], strides = [1, 1, 1]} : vector<2x8x32xf32> to vector<2x8x8xf32>
    %74 = vector.extract_strided_slice %50 {offsets = [0, 0, 8], sizes = [2, 8, 8], strides = [1, 1, 1]} : vector<2x8x32xf32> to vector<2x8x8xf32>
    "tpu.trace_start"() <{level = 10 : i32, message = "bsd,btd->bst"}> : () -> ()
    %cst_42 = arith.constant dense<0.000000e+00> : vector<2x8x8xf32>
    %75 = tpu.matmul %72, %73, %cst_42 {dimension_numbers = #tpu.dot_dimension_numbers<[2], [2], [1], [1], [0, 0, 0, 1, 1, 1], [0], [0]>} : vector<2x8x8xf32>, vector<2x8x8xf32>, vector<2x8x8xf32> -> vector<2x8x8xf32>
    "tpu.trace_stop"() : () -> ()
    %cst_43 = arith.constant 0.353553385 : f32
    %76 = vector.broadcast %cst_43 : f32 to vector<2x8x8xf32>
    %77 = arith.mulf %75, %76 : vector<2x8x8xf32>
    %cst_44 = arith.constant dense<0xFF800000> : vector<2x8xf32>
    %78 = vector.multi_reduction <maximumf>, %77, %cst_44 [2] : vector<2x8x8xf32> to vector<2x8xf32>
    %79 = vector.shape_cast %78 : vector<2x8xf32> to vector<2x8x1xf32>
    %80 = vector.broadcast %79 : vector<2x8x1xf32> to vector<2x8x8xf32>
    %81 = arith.subf %77, %80 : vector<2x8x8xf32>
    %82 = math.exp %81 : vector<2x8x8xf32>
    %cst_45 = arith.constant dense<0.000000e+00> : vector<2x8xf32>
    %83 = vector.multi_reduction <add>, %82, %cst_45 [2] : vector<2x8x8xf32> to vector<2x8xf32>
    %84 = vector.shape_cast %83 : vector<2x8xf32> to vector<2x8x1xf32>
    %85 = vector.broadcast %84 : vector<2x8x1xf32> to vector<2x8x8xf32>
    %86 = arith.divf %82, %85 : vector<2x8x8xf32>
    "tpu.trace_start"() <{level = 10 : i32, message = "bst,btd->bsd"}> : () -> ()
    %cst_46 = arith.constant dense<0.000000e+00> : vector<2x8x8xf32>
    %87 = tpu.matmul %86, %74, %cst_46 {dimension_numbers = #tpu.dot_dimension_numbers<[2], [1], [1], [2], [0, 0, 0, 1, 1, 2], [0], [0]>} : vector<2x8x8xf32>, vector<2x8x8xf32>, vector<2x8x8xf32> -> vector<2x8x8xf32>
    "tpu.trace_stop"() : () -> ()
    %88 = vector.shape_cast %87 : vector<2x8x8xf32> to vector<16x8xf32>
    %89 = vector.extract_strided_slice %16 {offsets = [8, 0], sizes = [8, 32], strides = [1, 1]} : vector<32x32xf32> to vector<8x32xf32>
    %cst_47 = arith.constant dense<0.000000e+00> : vector<16x32xf32>
    %90 = tpu.matmul %88, %89, %cst_47 {dimension_numbers = #tpu.dot_dimension_numbers<[1], [0], [0], [1], [0, 0, 1, 1], [], []>} : vector<16x8xf32>, vector<8x32xf32>, vector<16x32xf32> -> vector<16x32xf32>
    %91 = arith.addf %71, %90 : vector<16x32xf32>
    %92 = vector.extract_strided_slice %46 {offsets = [0, 0, 16], sizes = [2, 8, 8], strides = [1, 1, 1]} : vector<2x8x32xf32> to vector<2x8x8xf32>
    %93 = vector.extract_strided_slice %48 {offsets = [0, 0, 16], sizes = [2, 8, 8], strides = [1, 1, 1]} : vector<2x8x32xf32> to vector<2x8x8xf32>
    %94 = vector.extract_strided_slice %50 {offsets = [0, 0, 16], sizes = [2, 8, 8], strides = [1, 1, 1]} : vector<2x8x32xf32> to vector<2x8x8xf32>
    "tpu.trace_start"() <{level = 10 : i32, message = "bsd,btd->bst"}> : () -> ()
    %cst_48 = arith.constant dense<0.000000e+00> : vector<2x8x8xf32>
    %95 = tpu.matmul %92, %93, %cst_48 {dimension_numbers = #tpu.dot_dimension_numbers<[2], [2], [1], [1], [0, 0, 0, 1, 1, 1], [0], [0]>} : vector<2x8x8xf32>, vector<2x8x8xf32>, vector<2x8x8xf32> -> vector<2x8x8xf32>
    "tpu.trace_stop"() : () -> ()
    %cst_49 = arith.constant 0.353553385 : f32
    %96 = vector.broadcast %cst_49 : f32 to vector<2x8x8xf32>
    %97 = arith.mulf %95, %96 : vector<2x8x8xf32>
    %cst_50 = arith.constant dense<0xFF800000> : vector<2x8xf32>
    %98 = vector.multi_reduction <maximumf>, %97, %cst_50 [2] : vector<2x8x8xf32> to vector<2x8xf32>
    %99 = vector.shape_cast %98 : vector<2x8xf32> to vector<2x8x1xf32>
    %100 = vector.broadcast %99 : vector<2x8x1xf32> to vector<2x8x8xf32>
    %101 = arith.subf %97, %100 : vector<2x8x8xf32>
    %102 = math.exp %101 : vector<2x8x8xf32>
    %cst_51 = arith.constant dense<0.000000e+00> : vector<2x8xf32>
    %103 = vector.multi_reduction <add>, %102, %cst_51 [2] : vector<2x8x8xf32> to vector<2x8xf32>
    %104 = vector.shape_cast %103 : vector<2x8xf32> to vector<2x8x1xf32>
    %105 = vector.broadcast %104 : vector<2x8x1xf32> to vector<2x8x8xf32>
    %106 = arith.divf %102, %105 : vector<2x8x8xf32>
    "tpu.trace_start"() <{level = 10 : i32, message = "bst,btd->bsd"}> : () -> ()
    %cst_52 = arith.constant dense<0.000000e+00> : vector<2x8x8xf32>
    %107 = tpu.matmul %106, %94, %cst_52 {dimension_numbers = #tpu.dot_dimension_numbers<[2], [1], [1], [2], [0, 0, 0, 1, 1, 2], [0], [0]>} : vector<2x8x8xf32>, vector<2x8x8xf32>, vector<2x8x8xf32> -> vector<2x8x8xf32>
    "tpu.trace_stop"() : () -> ()
    %108 = vector.shape_cast %107 : vector<2x8x8xf32> to vector<16x8xf32>
    %109 = vector.extract_strided_slice %16 {offsets = [16, 0], sizes = [8, 32], strides = [1, 1]} : vector<32x32xf32> to vector<8x32xf32>
    %cst_53 = arith.constant dense<0.000000e+00> : vector<16x32xf32>
    %110 = tpu.matmul %108, %109, %cst_53 {dimension_numbers = #tpu.dot_dimension_numbers<[1], [0], [0], [1], [0, 0, 1, 1], [], []>} : vector<16x8xf32>, vector<8x32xf32>, vector<16x32xf32> -> vector<16x32xf32>
    %111 = arith.addf %91, %110 : vector<16x32xf32>
    %112 = vector.extract_strided_slice %46 {offsets = [0, 0, 24], sizes = [2, 8, 8], strides = [1, 1, 1]} : vector<2x8x32xf32> to vector<2x8x8xf32>
    %113 = vector.extract_strided_slice %48 {offsets = [0, 0, 24], sizes = [2, 8, 8], strides = [1, 1, 1]} : vector<2x8x32xf32> to vector<2x8x8xf32>
    %114 = vector.extract_strided_slice %50 {offsets = [0, 0, 24], sizes = [2, 8, 8], strides = [1, 1, 1]} : vector<2x8x32xf32> to vector<2x8x8xf32>
    "tpu.trace_start"() <{level = 10 : i32, message = "bsd,btd->bst"}> : () -> ()
    %cst_54 = arith.constant dense<0.000000e+00> : vector<2x8x8xf32>
    %115 = tpu.matmul %112, %113, %cst_54 {dimension_numbers = #tpu.dot_dimension_numbers<[2], [2], [1], [1], [0, 0, 0, 1, 1, 1], [0], [0]>} : vector<2x8x8xf32>, vector<2x8x8xf32>, vector<2x8x8xf32> -> vector<2x8x8xf32>
    "tpu.trace_stop"() : () -> ()
    %cst_55 = arith.constant 0.353553385 : f32
    %116 = vector.broadcast %cst_55 : f32 to vector<2x8x8xf32>
    %117 = arith.mulf %115, %116 : vector<2x8x8xf32>
    %cst_56 = arith.constant dense<0xFF800000> : vector<2x8xf32>
    %118 = vector.multi_reduction <maximumf>, %117, %cst_56 [2] : vector<2x8x8xf32> to vector<2x8xf32>
    %119 = vector.shape_cast %118 : vector<2x8xf32> to vector<2x8x1xf32>
    %120 = vector.broadcast %119 : vector<2x8x1xf32> to vector<2x8x8xf32>
    %121 = arith.subf %117, %120 : vector<2x8x8xf32>
    %122 = math.exp %121 : vector<2x8x8xf32>
    %cst_57 = arith.constant dense<0.000000e+00> : vector<2x8xf32>
    %123 = vector.multi_reduction <add>, %122, %cst_57 [2] : vector<2x8x8xf32> to vector<2x8xf32>
    %124 = vector.shape_cast %123 : vector<2x8xf32> to vector<2x8x1xf32>
    %125 = vector.broadcast %124 : vector<2x8x1xf32> to vector<2x8x8xf32>
    %126 = arith.divf %122, %125 : vector<2x8x8xf32>
    "tpu.trace_start"() <{level = 10 : i32, message = "bst,btd->bsd"}> : () -> ()
    %cst_58 = arith.constant dense<0.000000e+00> : vector<2x8x8xf32>
    %127 = tpu.matmul %126, %114, %cst_58 {dimension_numbers = #tpu.dot_dimension_numbers<[2], [1], [1], [2], [0, 0, 0, 1, 1, 2], [0], [0]>} : vector<2x8x8xf32>, vector<2x8x8xf32>, vector<2x8x8xf32> -> vector<2x8x8xf32>
    "tpu.trace_stop"() : () -> ()
    %128 = vector.shape_cast %127 : vector<2x8x8xf32> to vector<16x8xf32>
    %129 = vector.extract_strided_slice %16 {offsets = [24, 0], sizes = [8, 32], strides = [1, 1]} : vector<32x32xf32> to vector<8x32xf32>
    %cst_59 = arith.constant dense<0.000000e+00> : vector<16x32xf32>
    %130 = tpu.matmul %128, %129, %cst_59 {dimension_numbers = #tpu.dot_dimension_numbers<[1], [0], [0], [1], [0, 0, 1, 1], [], []>} : vector<16x8xf32>, vector<8x32xf32>, vector<16x32xf32> -> vector<16x32xf32>
    %131 = arith.addf %111, %130 : vector<16x32xf32>
    %132 = vector.broadcast %17 : vector<1x32xf32> to vector<16x32xf32>
    %133 = arith.addf %131, %132 : vector<16x32xf32>
    %134 = arith.addf %9, %133 : vector<16x32xf32>
    %cst_60 = arith.constant dense<0.000000e+00> : vector<16xf32>
    %135 = vector.multi_reduction <add>, %134, %cst_60 [1] : vector<16x32xf32> to vector<16xf32>
    %136 = vector.shape_cast %135 : vector<16xf32> to vector<16x1xf32>
    %cst_61 = arith.constant 3.200000e+01 : f32
    %137 = vector.broadcast %cst_61 : f32 to vector<16x1xf32>
    %138 = arith.divf %136, %137 : vector<16x1xf32>
    %139 = vector.broadcast %138 : vector<16x1xf32> to vector<16x32xf32>
    %140 = arith.subf %134, %139 : vector<16x32xf32>
    %141 = arith.mulf %140, %140 : vector<16x32xf32>
    %cst_62 = arith.constant dense<0.000000e+00> : vector<16xf32>
    %142 = vector.multi_reduction <add>, %141, %cst_62 [1] : vector<16x32xf32> to vector<16xf32>
    %143 = vector.shape_cast %142 : vector<16xf32> to vector<16x1xf32>
    %cst_63 = arith.constant 3.200000e+01 : f32
    %144 = vector.broadcast %cst_63 : f32 to vector<16x1xf32>
    %145 = arith.divf %143, %144 : vector<16x1xf32>
    %cst_64 = arith.constant 9.99999974E-6 : f32
    %146 = vector.broadcast %cst_64 : f32 to vector<16x1xf32>
    %147 = arith.addf %145, %146 : vector<16x1xf32>
    %148 = math.rsqrt %147 : vector<16x1xf32>
    %149 = vector.broadcast %148 : vector<16x1xf32> to vector<16x32xf32>
    %150 = arith.mulf %140, %149 : vector<16x32xf32>
    %151 = vector.broadcast %12 : vector<1x32xf32> to vector<16x32xf32>
    %152 = arith.mulf %150, %151 : vector<16x32xf32>
    %153 = vector.broadcast %13 : vector<1x32xf32> to vector<16x32xf32>
    %154 = arith.addf %152, %153 : vector<16x32xf32>
    %cst_65 = arith.constant dense<0.000000e+00> : vector<16x64xf32>
    %155 = tpu.matmul %154, %18, %cst_65 {dimension_numbers = #tpu.dot_dimension_numbers<[1], [0], [0], [1], [0, 0, 1, 1], [], []>} : vector<16x32xf32>, vector<32x64xf32>, vector<16x64xf32> -> vector<16x64xf32>
    %156 = vector.broadcast %19 : vector<1x64xf32> to vector<16x64xf32>
    %157 = arith.addf %155, %156 : vector<16x64xf32>
    %cst_66 = arith.constant 0.000000e+00 : f32
    %158 = vector.broadcast %cst_66 : f32 to vector<16x64xf32>
    %159 = arith.maximumf %157, %158 : vector<16x64xf32>
    %cst_67 = arith.constant dense<0.000000e+00> : vector<16x32xf32>
    %160 = tpu.matmul %159, %20, %cst_67 {dimension_numbers = #tpu.dot_dimension_numbers<[1], [0], [0], [1], [0, 0, 1, 1], [], []>} : vector<16x64xf32>, vector<64x32xf32>, vector<16x32xf32> -> vector<16x32xf32>
    %161 = vector.broadcast %21 : vector<1x32xf32> to vector<16x32xf32>
    %162 = arith.addf %160, %161 : vector<16x32xf32>
    %163 = arith.addf %134, %162 : vector<16x32xf32>
    %cst_68 = arith.constant dense<0.000000e+00> : vector<16xf32>
    %164 = vector.multi_reduction <add>, %163, %cst_68 [1] : vector<16x32xf32> to vector<16xf32>
    %165 = vector.shape_cast %164 : vector<16xf32> to vector<16x1xf32>
    %cst_69 = arith.constant 3.200000e+01 : f32
    %166 = vector.broadcast %cst_69 : f32 to vector<16x1xf32>
    %167 = arith.divf %165, %166 : vector<16x1xf32>
    %168 = vector.broadcast %167 : vector<16x1xf32> to vector<16x32xf32>
    %169 = arith.subf %163, %168 : vector<16x32xf32>
    %170 = arith.mulf %169, %169 : vector<16x32xf32>
    %cst_70 = arith.constant dense<0.000000e+00> : vector<16xf32>
    %171 = vector.multi_reduction <add>, %170, %cst_70 [1] : vector<16x32xf32> to vector<16xf32>
    %172 = vector.shape_cast %171 : vector<16xf32> to vector<16x1xf32>
    %cst_71 = arith.constant 3.200000e+01 : f32
    %173 = vector.broadcast %cst_71 : f32 to vector<16x1xf32>
    %174 = arith.divf %172, %173 : vector<16x1xf32>
    %cst_72 = arith.constant 9.99999974E-6 : f32
    %175 = vector.broadcast %cst_72 : f32 to vector<16x1xf32>
    %176 = arith.addf %174, %175 : vector<16x1xf32>
    %177 = math.rsqrt %176 : vector<16x1xf32>
    %178 = vector.broadcast %177 : vector<16x1xf32> to vector<16x32xf32>
    %179 = arith.mulf %169, %178 : vector<16x32xf32>
    %180 = vector.broadcast %10 : vector<1x32xf32> to vector<16x32xf32>
    %181 = arith.mulf %179, %180 : vector<16x32xf32>
    %182 = vector.broadcast %11 : vector<1x32xf32> to vector<16x32xf32>
    %183 = arith.addf %181, %182 : vector<16x32xf32>
    %cst_73 = arith.constant dense<0.000000e+00> : vector<16x96xf32>
    %184 = tpu.matmul %183, %14, %cst_73 {dimension_numbers = #tpu.dot_dimension_numbers<[1], [0], [0], [1], [0, 0, 1, 1], [], []>} : vector<16x32xf32>, vector<32x96xf32>, vector<16x96xf32> -> vector<16x96xf32>
    %185 = vector.broadcast %15 : vector<1x96xf32> to vector<16x96xf32>
    %186 = arith.addf %184, %185 : vector<16x96xf32>
    %187 = vector.extract_strided_slice %186 {offsets = [0, 0], sizes = [16, 32], strides = [1, 1]} : vector<16x96xf32> to vector<16x32xf32>
    %188 = vector.shape_cast %187 : vector<16x32xf32> to vector<2x8x32xf32>
    %189 = vector.extract_strided_slice %186 {offsets = [0, 32], sizes = [16, 32], strides = [1, 1]} : vector<16x96xf32> to vector<16x32xf32>
    %190 = vector.shape_cast %189 : vector<16x32xf32> to vector<2x8x32xf32>
    %191 = vector.extract_strided_slice %186 {offsets = [0, 64], sizes = [16, 32], strides = [1, 1]} : vector<16x96xf32> to vector<16x32xf32>
    %192 = vector.shape_cast %191 : vector<16x32xf32> to vector<2x8x32xf32>
    %cst_74 = arith.constant 0.000000e+00 : f32
    %193 = vector.broadcast %cst_74 : f32 to vector<16x32xf32>
    %194 = vector.extract_strided_slice %188 {offsets = [0, 0, 0], sizes = [2, 8, 8], strides = [1, 1, 1]} : vector<2x8x32xf32> to vector<2x8x8xf32>
    %195 = vector.extract_strided_slice %190 {offsets = [0, 0, 0], sizes = [2, 8, 8], strides = [1, 1, 1]} : vector<2x8x32xf32> to vector<2x8x8xf32>
    %196 = vector.extract_strided_slice %192 {offsets = [0, 0, 0], sizes = [2, 8, 8], strides = [1, 1, 1]} : vector<2x8x32xf32> to vector<2x8x8xf32>
    "tpu.trace_start"() <{level = 10 : i32, message = "bsd,btd->bst"}> : () -> ()
    %cst_75 = arith.constant dense<0.000000e+00> : vector<2x8x8xf32>
    %197 = tpu.matmul %194, %195, %cst_75 {dimension_numbers = #tpu.dot_dimension_numbers<[2], [2], [1], [1], [0, 0, 0, 1, 1, 1], [0], [0]>} : vector<2x8x8xf32>, vector<2x8x8xf32>, vector<2x8x8xf32> -> vector<2x8x8xf32>
    "tpu.trace_stop"() : () -> ()
    %cst_76 = arith.constant 0.353553385 : f32
    %198 = vector.broadcast %cst_76 : f32 to vector<2x8x8xf32>
    %199 = arith.mulf %197, %198 : vector<2x8x8xf32>
    %cst_77 = arith.constant dense<0xFF800000> : vector<2x8xf32>
    %200 = vector.multi_reduction <maximumf>, %199, %cst_77 [2] : vector<2x8x8xf32> to vector<2x8xf32>
    %201 = vector.shape_cast %200 : vector<2x8xf32> to vector<2x8x1xf32>
    %202 = vector.broadcast %201 : vector<2x8x1xf32> to vector<2x8x8xf32>
    %203 = arith.subf %199, %202 : vector<2x8x8xf32>
    %204 = math.exp %203 : vector<2x8x8xf32>
    %cst_78 = arith.constant dense<0.000000e+00> : vector<2x8xf32>
    %205 = vector.multi_reduction <add>, %204, %cst_78 [2] : vector<2x8x8xf32> to vector<2x8xf32>
    %206 = vector.shape_cast %205 : vector<2x8xf32> to vector<2x8x1xf32>
    %207 = vector.broadcast %206 : vector<2x8x1xf32> to vector<2x8x8xf32>
    %208 = arith.divf %204, %207 : vector<2x8x8xf32>
    "tpu.trace_start"() <{level = 10 : i32, message = "bst,btd->bsd"}> : () -> ()
    %cst_79 = arith.constant dense<0.000000e+00> : vector<2x8x8xf32>
    %209 = tpu.matmul %208, %196, %cst_79 {dimension_numbers = #tpu.dot_dimension_numbers<[2], [1], [1], [2], [0, 0, 0, 1, 1, 2], [0], [0]>} : vector<2x8x8xf32>, vector<2x8x8xf32>, vector<2x8x8xf32> -> vector<2x8x8xf32>
    "tpu.trace_stop"() : () -> ()
    %210 = vector.shape_cast %209 : vector<2x8x8xf32> to vector<16x8xf32>
    %211 = vector.extract_strided_slice %16 {offsets = [0, 0], sizes = [8, 32], strides = [1, 1]} : vector<32x32xf32> to vector<8x32xf32>
    %cst_80 = arith.constant dense<0.000000e+00> : vector<16x32xf32>
    %212 = tpu.matmul %210, %211, %cst_80 {dimension_numbers = #tpu.dot_dimension_numbers<[1], [0], [0], [1], [0, 0, 1, 1], [], []>} : vector<16x8xf32>, vector<8x32xf32>, vector<16x32xf32> -> vector<16x32xf32>
    %213 = arith.addf %193, %212 : vector<16x32xf32>
    %214 = vector.extract_strided_slice %188 {offsets = [0, 0, 8], sizes = [2, 8, 8], strides = [1, 1, 1]} : vector<2x8x32xf32> to vector<2x8x8xf32>
    %215 = vector.extract_strided_slice %190 {offsets = [0, 0, 8], sizes = [2, 8, 8], strides = [1, 1, 1]} : vector<2x8x32xf32> to vector<2x8x8xf32>
    %216 = vector.extract_strided_slice %192 {offsets = [0, 0, 8], sizes = [2, 8, 8], strides = [1, 1, 1]} : vector<2x8x32xf32> to vector<2x8x8xf32>
    "tpu.trace_start"() <{level = 10 : i32, message = "bsd,btd->bst"}> : () -> ()
    %cst_81 = arith.constant dense<0.000000e+00> : vector<2x8x8xf32>
    %217 = tpu.matmul %214, %215, %cst_81 {dimension_numbers = #tpu.dot_dimension_numbers<[2], [2], [1], [1], [0, 0, 0, 1, 1, 1], [0], [0]>} : vector<2x8x8xf32>, vector<2x8x8xf32>, vector<2x8x8xf32> -> vector<2x8x8xf32>
    "tpu.trace_stop"() : () -> ()
    %cst_82 = arith.constant 0.353553385 : f32
    %218 = vector.broadcast %cst_82 : f32 to vector<2x8x8xf32>
    %219 = arith.mulf %217, %218 : vector<2x8x8xf32>
    %cst_83 = arith.constant dense<0xFF800000> : vector<2x8xf32>
    %220 = vector.multi_reduction <maximumf>, %219, %cst_83 [2] : vector<2x8x8xf32> to vector<2x8xf32>
    %221 = vector.shape_cast %220 : vector<2x8xf32> to vector<2x8x1xf32>
    %222 = vector.broadcast %221 : vector<2x8x1xf32> to vector<2x8x8xf32>
    %223 = arith.subf %219, %222 : vector<2x8x8xf32>
    %224 = math.exp %223 : vector<2x8x8xf32>
    %cst_84 = arith.constant dense<0.000000e+00> : vector<2x8xf32>
    %225 = vector.multi_reduction <add>, %224, %cst_84 [2] : vector<2x8x8xf32> to vector<2x8xf32>
    %226 = vector.shape_cast %225 : vector<2x8xf32> to vector<2x8x1xf32>
    %227 = vector.broadcast %226 : vector<2x8x1xf32> to vector<2x8x8xf32>
    %228 = arith.divf %224, %227 : vector<2x8x8xf32>
    "tpu.trace_start"() <{level = 10 : i32, message = "bst,btd->bsd"}> : () -> ()
    %cst_85 = arith.constant dense<0.000000e+00> : vector<2x8x8xf32>
    %229 = tpu.matmul %228, %216, %cst_85 {dimension_numbers = #tpu.dot_dimension_numbers<[2], [1], [1], [2], [0, 0, 0, 1, 1, 2], [0], [0]>} : vector<2x8x8xf32>, vector<2x8x8xf32>, vector<2x8x8xf32> -> vector<2x8x8xf32>
    "tpu.trace_stop"() : () -> ()
    %230 = vector.shape_cast %229 : vector<2x8x8xf32> to vector<16x8xf32>
    %231 = vector.extract_strided_slice %16 {offsets = [8, 0], sizes = [8, 32], strides = [1, 1]} : vector<32x32xf32> to vector<8x32xf32>
    %cst_86 = arith.constant dense<0.000000e+00> : vector<16x32xf32>
    %232 = tpu.matmul %230, %231, %cst_86 {dimension_numbers = #tpu.dot_dimension_numbers<[1], [0], [0], [1], [0, 0, 1, 1], [], []>} : vector<16x8xf32>, vector<8x32xf32>, vector<16x32xf32> -> vector<16x32xf32>
    %233 = arith.addf %213, %232 : vector<16x32xf32>
    %234 = vector.extract_strided_slice %188 {offsets = [0, 0, 16], sizes = [2, 8, 8], strides = [1, 1, 1]} : vector<2x8x32xf32> to vector<2x8x8xf32>
    %235 = vector.extract_strided_slice %190 {offsets = [0, 0, 16], sizes = [2, 8, 8], strides = [1, 1, 1]} : vector<2x8x32xf32> to vector<2x8x8xf32>
    %236 = vector.extract_strided_slice %192 {offsets = [0, 0, 16], sizes = [2, 8, 8], strides = [1, 1, 1]} : vector<2x8x32xf32> to vector<2x8x8xf32>
    "tpu.trace_start"() <{level = 10 : i32, message = "bsd,btd->bst"}> : () -> ()
    %cst_87 = arith.constant dense<0.000000e+00> : vector<2x8x8xf32>
    %237 = tpu.matmul %234, %235, %cst_87 {dimension_numbers = #tpu.dot_dimension_numbers<[2], [2], [1], [1], [0, 0, 0, 1, 1, 1], [0], [0]>} : vector<2x8x8xf32>, vector<2x8x8xf32>, vector<2x8x8xf32> -> vector<2x8x8xf32>
    "tpu.trace_stop"() : () -> ()
    %cst_88 = arith.constant 0.353553385 : f32
    %238 = vector.broadcast %cst_88 : f32 to vector<2x8x8xf32>
    %239 = arith.mulf %237, %238 : vector<2x8x8xf32>
    %cst_89 = arith.constant dense<0xFF800000> : vector<2x8xf32>
    %240 = vector.multi_reduction <maximumf>, %239, %cst_89 [2] : vector<2x8x8xf32> to vector<2x8xf32>
    %241 = vector.shape_cast %240 : vector<2x8xf32> to vector<2x8x1xf32>
    %242 = vector.broadcast %241 : vector<2x8x1xf32> to vector<2x8x8xf32>
    %243 = arith.subf %239, %242 : vector<2x8x8xf32>
    %244 = math.exp %243 : vector<2x8x8xf32>
    %cst_90 = arith.constant dense<0.000000e+00> : vector<2x8xf32>
    %245 = vector.multi_reduction <add>, %244, %cst_90 [2] : vector<2x8x8xf32> to vector<2x8xf32>
    %246 = vector.shape_cast %245 : vector<2x8xf32> to vector<2x8x1xf32>
    %247 = vector.broadcast %246 : vector<2x8x1xf32> to vector<2x8x8xf32>
    %248 = arith.divf %244, %247 : vector<2x8x8xf32>
    "tpu.trace_start"() <{level = 10 : i32, message = "bst,btd->bsd"}> : () -> ()
    %cst_91 = arith.constant dense<0.000000e+00> : vector<2x8x8xf32>
    %249 = tpu.matmul %248, %236, %cst_91 {dimension_numbers = #tpu.dot_dimension_numbers<[2], [1], [1], [2], [0, 0, 0, 1, 1, 2], [0], [0]>} : vector<2x8x8xf32>, vector<2x8x8xf32>, vector<2x8x8xf32> -> vector<2x8x8xf32>
    "tpu.trace_stop"() : () -> ()
    %250 = vector.shape_cast %249 : vector<2x8x8xf32> to vector<16x8xf32>
    %251 = vector.extract_strided_slice %16 {offsets = [16, 0], sizes = [8, 32], strides = [1, 1]} : vector<32x32xf32> to vector<8x32xf32>
    %cst_92 = arith.constant dense<0.000000e+00> : vector<16x32xf32>
    %252 = tpu.matmul %250, %251, %cst_92 {dimension_numbers = #tpu.dot_dimension_numbers<[1], [0], [0], [1], [0, 0, 1, 1], [], []>} : vector<16x8xf32>, vector<8x32xf32>, vector<16x32xf32> -> vector<16x32xf32>
    %253 = arith.addf %233, %252 : vector<16x32xf32>
    %254 = vector.extract_strided_slice %188 {offsets = [0, 0, 24], sizes = [2, 8, 8], strides = [1, 1, 1]} : vector<2x8x32xf32> to vector<2x8x8xf32>
    %255 = vector.extract_strided_slice %190 {offsets = [0, 0, 24], sizes = [2, 8, 8], strides = [1, 1, 1]} : vector<2x8x32xf32> to vector<2x8x8xf32>
    %256 = vector.extract_strided_slice %192 {offsets = [0, 0, 24], sizes = [2, 8, 8], strides = [1, 1, 1]} : vector<2x8x32xf32> to vector<2x8x8xf32>
    "tpu.trace_start"() <{level = 10 : i32, message = "bsd,btd->bst"}> : () -> ()
    %cst_93 = arith.constant dense<0.000000e+00> : vector<2x8x8xf32>
    %257 = tpu.matmul %254, %255, %cst_93 {dimension_numbers = #tpu.dot_dimension_numbers<[2], [2], [1], [1], [0, 0, 0, 1, 1, 1], [0], [0]>} : vector<2x8x8xf32>, vector<2x8x8xf32>, vector<2x8x8xf32> -> vector<2x8x8xf32>
    "tpu.trace_stop"() : () -> ()
    %cst_94 = arith.constant 0.353553385 : f32
    %258 = vector.broadcast %cst_94 : f32 to vector<2x8x8xf32>
    %259 = arith.mulf %257, %258 : vector<2x8x8xf32>
    %cst_95 = arith.constant dense<0xFF800000> : vector<2x8xf32>
    %260 = vector.multi_reduction <maximumf>, %259, %cst_95 [2] : vector<2x8x8xf32> to vector<2x8xf32>
    %261 = vector.shape_cast %260 : vector<2x8xf32> to vector<2x8x1xf32>
    %262 = vector.broadcast %261 : vector<2x8x1xf32> to vector<2x8x8xf32>
    %263 = arith.subf %259, %262 : vector<2x8x8xf32>
    %264 = math.exp %263 : vector<2x8x8xf32>
    %cst_96 = arith.constant dense<0.000000e+00> : vector<2x8xf32>
    %265 = vector.multi_reduction <add>, %264, %cst_96 [2] : vector<2x8x8xf32> to vector<2x8xf32>
    %266 = vector.shape_cast %265 : vector<2x8xf32> to vector<2x8x1xf32>
    %267 = vector.broadcast %266 : vector<2x8x1xf32> to vector<2x8x8xf32>
    %268 = arith.divf %264, %267 : vector<2x8x8xf32>
    "tpu.trace_start"() <{level = 10 : i32, message = "bst,btd->bsd"}> : () -> ()
    %cst_97 = arith.constant dense<0.000000e+00> : vector<2x8x8xf32>
    %269 = tpu.matmul %268, %256, %cst_97 {dimension_numbers = #tpu.dot_dimension_numbers<[2], [1], [1], [2], [0, 0, 0, 1, 1, 2], [0], [0]>} : vector<2x8x8xf32>, vector<2x8x8xf32>, vector<2x8x8xf32> -> vector<2x8x8xf32>
    "tpu.trace_stop"() : () -> ()
    %270 = vector.shape_cast %269 : vector<2x8x8xf32> to vector<16x8xf32>
    %271 = vector.extract_strided_slice %16 {offsets = [24, 0], sizes = [8, 32], strides = [1, 1]} : vector<32x32xf32> to vector<8x32xf32>
    %cst_98 = arith.constant dense<0.000000e+00> : vector<16x32xf32>
    %272 = tpu.matmul %270, %271, %cst_98 {dimension_numbers = #tpu.dot_dimension_numbers<[1], [0], [0], [1], [0, 0, 1, 1], [], []>} : vector<16x8xf32>, vector<8x32xf32>, vector<16x32xf32> -> vector<16x32xf32>
    %273 = arith.addf %253, %272 : vector<16x32xf32>
    %274 = vector.broadcast %17 : vector<1x32xf32> to vector<16x32xf32>
    %275 = arith.addf %273, %274 : vector<16x32xf32>
    %276 = arith.addf %163, %275 : vector<16x32xf32>
    %cst_99 = arith.constant dense<0.000000e+00> : vector<16xf32>
    %277 = vector.multi_reduction <add>, %276, %cst_99 [1] : vector<16x32xf32> to vector<16xf32>
    %278 = vector.shape_cast %277 : vector<16xf32> to vector<16x1xf32>
    %cst_100 = arith.constant 3.200000e+01 : f32
    %279 = vector.broadcast %cst_100 : f32 to vector<16x1xf32>
    %280 = arith.divf %278, %279 : vector<16x1xf32>
    %281 = vector.broadcast %280 : vector<16x1xf32> to vector<16x32xf32>
    %282 = arith.subf %276, %281 : vector<16x32xf32>
    %283 = arith.mulf %282, %282 : vector<16x32xf32>
    %cst_101 = arith.constant dense<0.000000e+00> : vector<16xf32>
    %284 = vector.multi_reduction <add>, %283, %cst_101 [1] : vector<16x32xf32> to vector<16xf32>
    %285 = vector.shape_cast %284 : vector<16xf32> to vector<16x1xf32>
    %cst_102 = arith.constant 3.200000e+01 : f32
    %286 = vector.broadcast %cst_102 : f32 to vector<16x1xf32>
    %287 = arith.divf %285, %286 : vector<16x1xf32>
    %cst_103 = arith.constant 9.99999974E-6 : f32
    %288 = vector.broadcast %cst_103 : f32 to vector<16x1xf32>
    %289 = arith.addf %287, %288 : vector<16x1xf32>
    %290 = math.rsqrt %289 : vector<16x1xf32>
    %291 = vector.broadcast %290 : vector<16x1xf32> to vector<16x32xf32>
    %292 = arith.mulf %282, %291 : vector<16x32xf32>
    %293 = vector.broadcast %12 : vector<1x32xf32> to vector<16x32xf32>
    %294 = arith.mulf %292, %293 : vector<16x32xf32>
    %295 = vector.broadcast %13 : vector<1x32xf32> to vector<16x32xf32>
    %296 = arith.addf %294, %295 : vector<16x32xf32>
    %cst_104 = arith.constant dense<0.000000e+00> : vector<16x64xf32>
    %297 = tpu.matmul %296, %18, %cst_104 {dimension_numbers = #tpu.dot_dimension_numbers<[1], [0], [0], [1], [0, 0, 1, 1], [], []>} : vector<16x32xf32>, vector<32x64xf32>, vector<16x64xf32> -> vector<16x64xf32>
    %298 = vector.broadcast %19 : vector<1x64xf32> to vector<16x64xf32>
    %299 = arith.addf %297, %298 : vector<16x64xf32>
    %cst_105 = arith.constant 0.000000e+00 : f32
    %300 = vector.broadcast %cst_105 : f32 to vector<16x64xf32>
    %301 = arith.maximumf %299, %300 : vector<16x64xf32>
    %cst_106 = arith.constant dense<0.000000e+00> : vector<16x32xf32>
    %302 = tpu.matmul %301, %20, %cst_106 {dimension_numbers = #tpu.dot_dimension_numbers<[1], [0], [0], [1], [0, 0, 1, 1], [], []>} : vector<16x64xf32>, vector<64x32xf32>, vector<16x32xf32> -> vector<16x32xf32>
    %303 = vector.broadcast %21 : vector<1x32xf32> to vector<16x32xf32>
    %304 = arith.addf %302, %303 : vector<16x32xf32>
    %305 = arith.addf %276, %304 : vector<16x32xf32>
    %306 = vector.extract_strided_slice %305 {offsets = [0, 0], sizes = [1, 32], strides = [1, 1]} : vector<16x32xf32> to vector<1x32xf32>
    %307 = vector.extract_strided_slice %305 {offsets = [1, 0], sizes = [1, 32], strides = [1, 1]} : vector<16x32xf32> to vector<1x32xf32>
    %308 = vector.extract_strided_slice %305 {offsets = [2, 0], sizes = [1, 32], strides = [1, 1]} : vector<16x32xf32> to vector<1x32xf32>
    %309 = vector.extract_strided_slice %305 {offsets = [3, 0], sizes = [1, 32], strides = [1, 1]} : vector<16x32xf32> to vector<1x32xf32>
    %310 = vector.extract_strided_slice %305 {offsets = [4, 0], sizes = [1, 32], strides = [1, 1]} : vector<16x32xf32> to vector<1x32xf32>
    %311 = vector.extract_strided_slice %305 {offsets = [5, 0], sizes = [1, 32], strides = [1, 1]} : vector<16x32xf32> to vector<1x32xf32>
    %312 = vector.extract_strided_slice %305 {offsets = [6, 0], sizes = [1, 32], strides = [1, 1]} : vector<16x32xf32> to vector<1x32xf32>
    %313 = vector.extract_strided_slice %305 {offsets = [7, 0], sizes = [1, 32], strides = [1, 1]} : vector<16x32xf32> to vector<1x32xf32>
    %314 = tpu.concatenate %306, %307, %308, %309, %310, %311, %312, %313 in 1 : vector<1x32xf32>, vector<1x32xf32>, vector<1x32xf32>, vector<1x32xf32>, vector<1x32xf32>, vector<1x32xf32>, vector<1x32xf32>, vector<1x32xf32> -> vector<1x256xf32>
    %315 = vector.extract_strided_slice %305 {offsets = [8, 0], sizes = [1, 32], strides = [1, 1]} : vector<16x32xf32> to vector<1x32xf32>
    %316 = vector.extract_strided_slice %305 {offsets = [9, 0], sizes = [1, 32], strides = [1, 1]} : vector<16x32xf32> to vector<1x32xf32>
    %317 = vector.extract_strided_slice %305 {offsets = [10, 0], sizes = [1, 32], strides = [1, 1]} : vector<16x32xf32> to vector<1x32xf32>
    %318 = vector.extract_strided_slice %305 {offsets = [11, 0], sizes = [1, 32], strides = [1, 1]} : vector<16x32xf32> to vector<1x32xf32>
    %319 = vector.extract_strided_slice %305 {offsets = [12, 0], sizes = [1, 32], strides = [1, 1]} : vector<16x32xf32> to vector<1x32xf32>
    %320 = vector.extract_strided_slice %305 {offsets = [13, 0], sizes = [1, 32], strides = [1, 1]} : vector<16x32xf32> to vector<1x32xf32>
    %321 = vector.extract_strided_slice %305 {offsets = [14, 0], sizes = [1, 32], strides = [1, 1]} : vector<16x32xf32> to vector<1x32xf32>
    %322 = vector.extract_strided_slice %305 {offsets = [15, 0], sizes = [1, 32], strides = [1, 1]} : vector<16x32xf32> to vector<1x32xf32>
    %323 = tpu.concatenate %315, %316, %317, %318, %319, %320, %321, %322 in 1 : vector<1x32xf32>, vector<1x32xf32>, vector<1x32xf32>, vector<1x32xf32>, vector<1x32xf32>, vector<1x32xf32>, vector<1x32xf32>, vector<1x32xf32> -> vector<1x256xf32>
    %324 = tpu.concatenate %314, %323 in 0 : vector<1x256xf32>, vector<1x256xf32> -> vector<2x256xf32>
    %c0_107 = arith.constant 0 : index
    %c0_108 = arith.constant 0 : index
    %325 = vector.load %arg15[%c0_107, %c0_108] : memref<2x256xf32, #tpu.memory_space<vmem>>, vector<2x256xf32>
    tpu.vector_store %arg15[%c0_107, %c0_108], %324 {strides = array<i32>} : memref<2x256xf32, #tpu.memory_space<vmem>>, vector<2x256xf32>,
    return
  }
}

</mosaic_0001>

<bundles_post_ra>
// kernel: encoder_forward.1
= control target key start
LH: loop header
LB: loop body
LE: loop exit
PB: predicated region body
PF: predicated region fallthrough
CT: control target
= control target key end

     0   :  { %v4887_v0 = vmov 0   ;;  %v4888_v11 = vmov 0.0   ;;  %v52_v12 = vlaneseq  ;;  %vm76_vm0 = vcmask 523264   ;;  %s4890_s19 = smov 96   ;;  %s4892_s20 = smov 88   ;;  %s5677_s0 = inlined_call_operand.vmem [shape: s32[16,1], index: 0, kind: input, shape index: {}]   ;;  %s5678_s1 = inlined_call_operand.vmem [shape: f32[64,32], index: 1, kind: input, shape index: {}]   ;;  %s5679_s2 = inlined_call_operand.vmem [shape: f32[16,32], index: 2, kind: input, shape index: {}]   ;;  %s5680_s5 = inlined_call_operand.vmem [shape: f32[32,96], index: 5, kind: input, shape index: {}]   ;;  %s5681_s3 = inlined_call_operand.vmem [shape: f32[1,32], index: 3, kind: input, shape index: {}]   ;;  %s5682_s4 = inlined_call_operand.vmem [shape: f32[1,32], index: 4, kind: input, shape index: {}]   ;;  %s5683_s6 = inlined_call_operand.vmem [shape: f32[1,96], index: 6, kind: input, shape index: {}]   ;;  %s5684_s7 = inlined_call_operand.vmem [shape: f32[32,32], index: 7, kind: input, shape index: {}]   ;;  %s5685_s8 = inlined_call_operand.vmem [shape: f32[1,32], index: 8, kind: input, shape index: {}]   ;;  %s5686_s11 = inlined_call_operand.vmem [shape: f32[32,64], index: 11, kind: input, shape index: {}]   ;;  %s5687_s13 = inlined_call_operand.vmem [shape: f32[64,32], index: 13, kind: input, shape index: {}]   ;;  %s5688_s9 = inlined_call_operand.vmem [shape: f32[1,32], index: 9, kind: input, shape index: {}]   ;;  %s5689_s10 = inlined_call_operand.vmem [shape: f32[1,32], index: 10, kind: input, shape index: {}]   ;;  %s5690_s12 = inlined_call_operand.vmem [shape: f32[1,64], index: 12, kind: input, shape index: {}]   ;;  %s5691_s14 = inlined_call_operand.vmem [shape: f32[1,32], index: 14, kind: input, shape index: {}]   ;;  %s5692_s15 = inlined_call_operand.vmem [shape: f32[2,256], index: 15, kind: output, shape index: {}]  }
   0x1   :  { %4806 = vset.pattern.permute.xlu0 %v4887_v0  ;;  %v50_v1 = vld [vmem:[%s5677_s0] sm:$0xff]  ;;  %v73_v2 = vld [vmem:[%s5678_s1 + $0x38] sm:$0xff]  ;;  %v72_v3 = vld [vmem:[%s5678_s1 + $0x30] sm:$0xff]  ;;  %vm186_vm3 = vcmask 261120   ;;  %vm4889_vm4 = vmmov 0   ;;  %vm320_vm5 = vcmask 64512  }
   0x2   :  { %55 = vperm.xlu0 %4806, %v50_v1   ;;  %4490 = vmatprep.subr.mxu0 %v73_v2  ;;  %v51_v4 = vld [vmem:[%s5677_s0 + $0x8] sm:$0xff]  ;;  %v70_v6 = vld [vmem:[%s5678_s1 + $0x20] sm:$0xff]  ;;  %v69_v7 = vld [vmem:[%s5678_s1 + $0x18] sm:$0xff]  ;;  %v53_v13 = vand.u32 127, %v52_v12  ;;  %s4893_s21 = smov 120   ;;  %s4895_s22 = smov 80  }
   0x3   :  { %4491 = vmatpush3.msra.mxu0 %v73_v2  ;;  %v71_v5 = vld [vmem:[%s5678_s1 + $0x28] sm:$0xff]  ;;  %v68_v8 = vld [vmem:[%s5678_s1 + $0x10] sm:$0xff]  ;;  %v66_v10 = vld [vmem:[%s5678_s1] sm:$0xff]  ;;  %s4896_s23 = smov 112   ;;  %s4897_s27 = smov 48   ;;  %vm4196_vm6 = vcmask 785408  }
   0x4   :  { %4492 = vmatprep.subr.mxu0 %v72_v3  ;;  %v67_v9 = vld [vmem:[%s5678_s1 + $0x8] sm:$0xff]  ;;  %v74_v19 = vld [vmem:[%s5679_s2] sm:$0xff]  ;;  %v5038_v36 = vld [vmem:[%s5680_s5 + $0x18] sm:$0xff]  ;;  %s4894_s1 = smov 56   ;;  %s4898_s28 = smov 72   ;;  %vm4240_vm7 = vcmask 1040384  }
   0x5   :  { %4493 = vmatpush3.msra.mxu0 %v72_v3  ;;  %v75_v20 = vld [vmem:[%s5679_s2 + $0x8] sm:$0xff]  ;;  %v5043_v37 = vld [vmem:[%s5680_s5 + $0x10] sm:$0xff]  ;;  %4509 = vmatprep.subr.mxu1 %v5038_v36  ;;  %v5059_v39 = vld [vmem:[%s5680_s5] sm:$0xff]  ;;  %s4899_s29 = smov 104   ;;  %s4900_s0 = smov 40  }
   0x6   :  { %58 = vperm.xlu0 %4806, %v51_v4   ;;  %4494 = vmatprep.subr.mxu0 %v71_v5  ;;  %v5050_v38 = vld [vmem:[%s5680_s5 + $0x8] sm:$0xff]  ;;  %v5067_v47 = vld [vmem:[%s5681_s3] ss:$0 sm:$0xff] }
   0x7   :  { %4495 = vmatpush3.msra.mxu0 %v71_v5  ;;  %4510 = vmatpush3.msra.mxu1 %v5038_v36  ;;  %v5072_v49 = vld [vmem:[%s5682_s4] ss:$0 sm:$0xff] }
   0x8   :  { %4496 = vmatprep.subr.mxu0 %v70_v6  ;;  %4511 = vmatprep.subr.mxu1 %v5043_v37  ;;  %v5087_v57 = vld [vmem:[%s5683_s6] ss:$0 sm:$0xff]  ;;  %s4891_s6 = smov 64  }
   0x9   :  { %4497 = vmatpush3.msra.mxu0 %v70_v6  ;;  %4512 = vmatpush3.msra.mxu1 %v5043_v37 }
   0xa   :  { %4498 = vmatprep.subr.mxu0 %v69_v7  ;;  %4513 = vmatprep.subr.mxu1 %v5050_v38 }
   0xb   :  { %4499 = vmatpush3.msra.mxu0 %v69_v7  ;;  %4514 = vmatpush3.msra.mxu1 %v5050_v38 }
   0xc   :  { %4500 = vmatprep.subr.mxu0 %v68_v8  ;;  %4515 = vmatprep.subr.mxu1 %v5059_v39 }
   0xd   :  { %4501 = vmatpush3.msra.mxu0 %v68_v8  ;;  %4516 = vmatpush3.msra.mxu1 %v5059_v39 }
   0xe   :  { %4502 = vmatprep.subr.mxu0 %v67_v9  ;;  %4525 = vmatprep.subr.mxu1 %v4888_v11 }
   0xf   :  { %4503 = vmatpush3.msra.mxu0 %v67_v9 }
  0x10   :  { %4504 = vmatprep.subr.mxu0 %v66_v10 }
  0x11   :  { %4505 = vmatpush3.msra.mxu0 %v66_v10 }
  0x12   :  { %4520 = vmatprep.subr.mxu0 %v4888_v11 }
  0x7d   :  { %v56_v14 = vpop.permute.xlu0 %55 }
  0x7e   :  { %vm60_vm1 = vcmp.eq.s32.totalorder %v56_v14, %v53_v13 }
  0x7f   :  { %v4259_v15 = vsel %vm60_vm1, 1.0, %v4888_v11 }
  0x80   :  { %4506 = vmatprep.mubr.msk.f32.mxu0 %vm76_vm0, %v4259_v15 }
  0x81   :  { %v59_v16 = vpop.permute.xlu0 %58 }
  0x82   :  { %vm61_vm2 = vcmp.eq.s32.totalorder %v59_v16, %v53_v13 }
  0x83   :  { %v4260_v17 = vsel %vm61_vm2, 1.0, %v4888_v11 }
  0x84   :  { %4507 = vmatmul.mubr.msk.f32.vlgmr.msra.gmra.mxu0 %vm76_vm0, %v4260_v17 }
  0x85   :  { %4522 = vmatprep.mubr.msk.f32.mxu0 %vm4889_vm4, %v4888_v11 }
 0x144   :  { %v4508_v18 = vpop.f32.mrf.mxu0 }
 0x145   :  { %v5025_v23 = vadd.f32 %v4508_v18, %v75_v20 }
 0x146   :  { %v149_v21 = vpop.f32.mrf.mxu0 }
 0x147   :  { %v5023_v22 = vadd.f32 %v149_v21, %v74_v19  ;;  %v190_v25 = vsel %vm186_vm3, %v5025_v23, 0.0 }
 0x149   :  { %v187_v24 = vsel %vm186_vm3, %v5023_v22, 0.0 }
 0x14a   :  { %188 = vadd.xlane.f32.xlu1 %v187_v24 }
 0x14e   :  { %191 = vadd.xlane.f32.xlu1 %v190_v25 }
 0x1d3   :  { %v189_v26 = vpop.xlane.xlu1 %188 }
 0x1d4   :  { %v194_v27 = vmul.f32 0.03125, %v189_v26 }
 0x1d6   :  { %v196_v28 = vsub.f32 %v5023_v22, %v194_v27 }
 0x1d7   :  { %v192_v29 = vpop.xlane.xlu1 %191 }
 0x1d8   :  { %v195_v30 = vmul.f32 0.03125, %v192_v29  ;;  %v198_v31 = vmul.f32 %v196_v28, %v196_v28 }
 0x1da   :  { %v197_v32 = vsub.f32 %v5025_v23, %v195_v30  ;;  %v200_v33 = vsel %vm186_vm3, %v198_v31, 0.0 }
 0x1db   :  { %201 = vadd.xlane.f32.xlu0 %v200_v33 }
 0x1dc   :  { %v199_v34 = vmul.f32 %v197_v32, %v197_v32 }
 0x1de   :  { %v203_v35 = vsel %vm186_vm3, %v199_v34, 0.0 }
 0x1df   :  { %204 = vadd.xlane.f32.xlu1 %v203_v35 }
 0x264   :  { %v202_v40 = vpop.xlane.xlu0 %201 }
 0x265   :  { %v206_v41 = vmul.f32 0.03125, %v202_v40 }
 0x267   :  { %v208_v42 = vadd.f32 1e-05, %v206_v41 }
 0x268   :  { %v205_v43 = vpop.xlane.xlu1 %204 }
 0x269   :  { %4807 = vrsqrt.f32 %v208_v42  ;;  %v207_v44 = vmul.f32 0.03125, %v205_v43 }
 0x26b   :  { %v209_v45 = vadd.f32 1e-05, %v207_v44 }
 0x26d   :  { %4809 = vrsqrt.f32 %v209_v45 }
 0x276   :  { %v4808_v46 = vpop.eup %4807 }
 0x277   :  { %v212_v48 = vmul.f32 %v4808_v46, %v196_v28 }
 0x279   :  { %v220_v50 = vmul.f32 %v5067_v47, %v212_v48 }
 0x27a   :  { %v4810_v51 = vpop.eup %4809 }
 0x27b   :  { %v228_v52 = vadd.f32 %v5072_v49, %v220_v50  ;;  %v213_v53 = vmul.f32 %v4810_v51, %v197_v32 }
 0x27d   :  { %4517 = vmatprep.mubr.msk.f32.mxu1 %vm186_vm3, %v228_v52  ;;  %v221_v54 = vmul.f32 %v5067_v47, %v213_v53 }
 0x27f   :  { %v229_v55 = vadd.f32 %v5072_v49, %v221_v54 }
 0x281   :  { %4518 = vmatmul.mubr.msk.f32.vlgmr.msra.gmra.mxu1 %vm186_vm3, %v229_v55 }
 0x282   :  { %4527 = vmatprep.mubr.msk.f32.mxu1 %vm4889_vm4, %v4888_v11 }
 0x341   :  { %v4519_v56 = vpop.f32.mrf.mxu1 }
 0x342   :  { %v5095_v60 = vadd.f32 %v4519_v56, %v5087_v57 }
 0x343   :  { %v308_v58 = vpop.f32.mrf.mxu1 }
 0x344   :  { %v5090_v59 = vadd.f32 %v5087_v57, %v308_v58 }
 0x346   :  { %318 = vrot.lane.b32.xlu1 %v5090_v59, %s4890_s19 }
 0x34a   :  { %396 = vrot.lane.b32.xlu1 %v5095_v60, %s4890_s19 }
 0x3b8   :  { %v319_v61 = vpop.permute.xlu1 %318 }
 0x3b9   :  { %4521 = vmatpush3.xpose.msk.msra.mxu0 %vm320_vm5, %v319_v61 }
 0x3ba   :  { %4530 = vmatprep.subr.mxu0 %v4888_v11 }
 0x3bc   :  { %4523 = vmatmul.mubr.msk.f32.vlgmr.msra.gmra.mxu0 %vm320_vm5, %v5090_v59  ;;  %v397_v62 = vpop.permute.xlu1 %396 }
 0x3bd   :  { %4526 = vmatpush3.xpose.msk.msra.mxu1 %vm320_vm5, %v397_v62  ;;  %4532 = vmatprep.mubr.msk.f32.mxu0 %vm4889_vm4, %v4888_v11 }
 0x3be   :  { %4535 = vmatprep.subr.mxu1 %v4888_v11 }
 0x3c0   :  { %4528 = vmatmul.mubr.msk.f32.vlgmr.msra.gmra.mxu1 %vm320_vm5, %v5095_v60 }
 0x3c1   :  { %4537 = vmatprep.mubr.msk.f32.mxu1 %vm4889_vm4, %v4888_v11 }
 0x47c   :  { %v391_v63 = vpop.f32.mrf.mxu0 }
 0x47d   :  { %v472_v0 = vmul.f32 0.35355338, %v391_v63 }
 0x47e   :  { %v4524_v1 = vpop.f32.mrf.mxu0 }
 0x47f   :  { %v474_v2 = vsel %vm320_vm5, %v472_v0, -inf }
 0x480   :  { %475 = vmax.xlane.f32.xlu1 %v474_v2  ;;  %v468_v3 = vpop.f32.mrf.mxu1 }
 0x481   :  { %v473_v4 = vmul.f32 0.35355338, %v468_v3 }
 0x482   :  { %v4529_v5 = vpop.f32.mrf.mxu1 }
 0x483   :  { %v477_v6 = vsel %vm320_vm5, %v473_v4, -inf }
 0x484   :  { %478 = vmax.xlane.f32.xlu0 %v477_v6 }
 0x491   :  { %572 = vrot.lane.b32.xlu1 %v5095_v60, %s4891_s6 }
 0x49a   :  { %496 = vrot.lane.b32.xlu0 %v5090_v59, %s4891_s6 }
 0x49e   :  { %650 = vrot.lane.b32.xlu0 %v5090_v59, %s4892_s20 }
 0x4a2   :  { %728 = vrot.lane.b32.xlu0 %v5095_v60, %s4892_s20 }
 0x509   :  { %v476_v7 = vpop.xlane.xlu1 %475 }
 0x50a   :  { %v480_v8 = vsub.f32 %v472_v0, %v476_v7  ;;  %v5164_v0 = vld [vmem:[%s5684_s7] sm:$0xff] }
 0x50c   :  { %v482_v13 = vmul.f32 1.442695, %v480_v8 }
 0x50d   :  { %v479_v9 = vpop.xlane.xlu0 %478  ;;  %v573_v10 = vpop.permute.xlu1 %572 }
 0x50e   :  { %v481_v12 = vsub.f32 %v473_v4, %v479_v9  ;;  %4536 = vmatpush3.msra.mxu1 %v573_v10  ;;  %v5183_v10 = vld [vmem:[%s5684_s7 + $0x8] sm:$0xff] }
 0x50f   :  { %4545 = vmatprep.subr.mxu1 %v4888_v11 }
 0x510   :  { %v484_v14 = vmul.f32 1.442695, %v481_v12 }
 0x511   :  { %v497_v15 = vpop.permute.xlu0 %496 }
 0x512   :  { %4811 = vpow2.f32 %v484_v14  ;;  %4531 = vmatpush3.msra.mxu0 %v497_v15 }
 0x513   :  { %4540 = vmatprep.subr.mxu0 %v4888_v11  ;;  %4813 = vpow2.f32 %v482_v13 }
 0x515   :  { %v651_v20 = vpop.permute.xlu0 %650 }
 0x519   :  { %v729_v21 = vpop.permute.xlu0 %728 }
 0x51f   :  { %v4812_v16 = vpop.eup %4811 }
 0x520   :  { %v489_v17 = vsel %vm320_vm5, %v4812_v16, 0.0  ;;  %v4814_v18 = vpop.eup %4813 }
 0x521   :  { %490 = vadd.xlane.f32.xlu0 %v489_v17  ;;  %v486_v19 = vsel %vm320_vm5, %v4814_v18, 0.0 }
 0x525   :  { %487 = vadd.xlane.f32.xlu0 %v486_v19 }
 0x53b   :  { %648 = vrot.lane.b32.xlu0 %v5090_v59, %s4893_s21 }
 0x53f   :  { %726 = vrot.lane.b32.xlu0 %v5095_v60, %s4893_s21 }
 0x5aa   :  { %v491_v24 = vpop.xlane.xlu0 %490 }
 0x5ab   :  { %4815 = vrcp.f32 %v491_v24 }
 0x5ae   :  { %v488_v25 = vpop.xlane.xlu0 %487 }
 0x5af   :  { %4817 = vrcp.f32 %v488_v25 }
 0x5b2   :  { %v649_v27 = vpop.permute.xlu0 %648 }
 0x5b6   :  { %v727_v31 = vpop.permute.xlu0 %726 }
 0x5b8   :  { %v4816_v26 = vpop.eup %4815 }
 0x5b9   :  { %v495_v28 = vmul.f32 %v4816_v26, %v4812_v16 }
 0x5bb   :  { %4538 = vmatmul.mubr.msk.f32.vlgmr.msra.gmra.mxu1 %vm320_vm5, %v495_v28 }
 0x5bc   :  { %v4818_v29 = vpop.eup %4817  ;;  %4546 = vmatpush3.xpose.msk.msra.mxu1 %vm320_vm5, %v729_v21  ;;  %4547 = vmatprep.mubr.msk.f32.mxu1 %vm4889_vm4, %v4888_v11 }
 0x5bd   :  { %v493_v30 = vmul.f32 %v4818_v29, %v4814_v18  ;;  %4555 = vmatprep.subr.mxu1 %v4888_v11 }
 0x5bf   :  { %4533 = vmatmul.mubr.msk.f32.vlgmr.msra.gmra.mxu0 %vm320_vm5, %v493_v30  ;;  %4548 = vmatmul.mubr.msk.f32.vlgmr.msra.gmra.mxu1 %vm320_vm5, %v727_v31 }
 0x5c0   :  { %4541 = vmatpush3.xpose.msk.msra.mxu0 %vm320_vm5, %v651_v20  ;;  %4542 = vmatprep.mubr.msk.f32.mxu0 %vm4889_vm4, %v4888_v11 }
 0x5c1   :  { %4550 = vmatprep.subr.mxu0 %v4888_v11  ;;  %4557 = vmatprep.mubr.msk.f32.mxu1 %vm4889_vm4, %v4888_v11 }
 0x5c3   :  { %4543 = vmatmul.mubr.msk.f32.vlgmr.msra.gmra.mxu0 %vm320_vm5, %v649_v27 }
 0x5c4   :  { %4552 = vmatprep.mubr.msk.f32.mxu0 %vm4889_vm4, %v4888_v11 }
 0x67b   :  { %v644_v32 = vpop.f32.mrf.mxu1 }
 0x67d   :  { %v4539_v33 = vpop.f32.mrf.mxu1 }
 0x67f   :  { %v568_v34 = vpop.f32.mrf.mxu0  ;;  %v800_v35 = vpop.f32.mrf.mxu1 }
 0x680   :  { %v805_v40 = vmul.f32 0.35355338, %v800_v35 }
 0x681   :  { %v4534_v41 = vpop.f32.mrf.mxu0  ;;  %v4549_v42 = vpop.f32.mrf.mxu1 }
 0x682   :  { %v809_v43 = vsel %vm320_vm5, %v805_v40, -inf }
 0x683   :  { %v722_v44 = vpop.f32.mrf.mxu0  ;;  %810 = vmax.xlane.f32.xlu0 %v809_v43 }
 0x684   :  { %v804_v45 = vmul.f32 0.35355338, %v722_v44 }
 0x685   :  { %v4544_v46 = vpop.f32.mrf.mxu0 }
 0x686   :  { %v806_v48 = vsel %vm320_vm5, %v804_v45, -inf }
 0x687   :  { %807 = vmax.xlane.f32.xlu1 %v806_v48 }
 0x70c   :  { %v811_v50 = vpop.xlane.xlu0 %810 }
 0x70d   :  { %v813_v51 = vsub.f32 %v805_v40, %v811_v50 }
 0x70f   :  { %v816_v52 = vmul.f32 1.442695, %v813_v51 }
 0x710   :  { %v808_v53 = vpop.xlane.xlu1 %807 }
 0x711   :  { %4819 = vpow2.f32 %v816_v52  ;;  %v812_v54 = vsub.f32 %v804_v45, %v808_v53 }
 0x713   :  { %v814_v55 = vmul.f32 1.442695, %v812_v54 }
 0x715   :  { %4821 = vpow2.f32 %v814_v55 }
 0x71e   :  { %v4820_v56 = vpop.eup %4819 }
 0x71f   :  { %v821_v58 = vsel %vm320_vm5, %v4820_v56, 0.0 }
 0x720   :  { %822 = vadd.xlane.f32.xlu1 %v821_v58 }
 0x722   :  { %v4822_v61 = vpop.eup %4821 }
 0x723   :  { %v818_v62 = vsel %vm320_vm5, %v4822_v61, 0.0 }
 0x724   :  { %819 = vadd.xlane.f32.xlu0 %v818_v62 }
 0x731   :  { %904 = vrot.lane.b32.xlu1 %v5095_v60, %s4894_s1 }
 0x735   :  { %1144 = vrot.lane.b32.xlu1 %v5090_v59, %s4895_s22 }
 0x739   :  { %1142 = vrot.lane.b32.xlu1 %v5090_v59, %s4896_s23 }
 0x73a   :  { %828 = vrot.lane.b32.xlu0 %v5090_v59, %s4894_s1 }
 0x73e   :  { %1222 = vrot.lane.b32.xlu0 %v5095_v60, %s4895_s22 }
 0x742   :  { %1220 = vrot.lane.b32.xlu0 %v5095_v60, %s4896_s23 }
 0x7a9   :  { %v823_v63 = vpop.xlane.xlu1 %822 }
 0x7aa   :  { %4823 = vrcp.f32 %v823_v63 }
 0x7ad   :  { %v820_v1 = vpop.xlane.xlu0 %819  ;;  %v905_v2 = vpop.permute.xlu1 %904 }
 0x7ae   :  { %4825 = vrcp.f32 %v820_v1  ;;  %4556 = vmatpush3.msra.mxu1 %v905_v2 }
 0x7af   :  { %4565 = vmatprep.subr.mxu1 %v5164_v0 }
 0x7b1   :  { %v829_v3 = vpop.permute.xlu0 %828  ;;  %v1145_v14 = vpop.permute.xlu1 %1144 }
 0x7b2   :  { %4551 = vmatpush3.msra.mxu0 %v829_v3 }
 0x7b3   :  { %4560 = vmatprep.subr.mxu0 %v5183_v10 }
 0x7b5   :  { %v1223_v7 = vpop.permute.xlu0 %1222  ;;  %v1143_v20 = vpop.permute.xlu1 %1142 }
 0x7b7   :  { %v4824_v4 = vpop.eup %4823 }
 0x7b8   :  { %v827_v5 = vmul.f32 %v4824_v4, %v4820_v56  ;;  %v5235_v4 = vld [vmem:[%s5684_s7 + $0x10] sm:$0xff] }
 0x7b9   :  { %v1221_v9 = vpop.permute.xlu0 %1220 }
 0x7ba   :  { %4558 = vmatmul.mubr.msk.f32.vlgmr.msra.gmra.mxu1 %vm320_vm5, %v827_v5 }
 0x7bb   :  { %v4826_v6 = vpop.eup %4825  ;;  %4567 = vmatprep.mubr.msk.f32.mxu1 %vm320_vm5, %v568_v34  ;;  %4566 = vmatpush3.msra.mxu1 %v5164_v0 }
 0x7bc   :  { %4575 = vmatprep.subr.mxu1 %v4888_v11  ;;  %v825_v8 = vmul.f32 %v4826_v6, %v4822_v61 }
 0x7be   :  { %4553 = vmatmul.mubr.msk.f32.vlgmr.msra.gmra.mxu0 %vm320_vm5, %v825_v8  ;;  %4568 = vmatmul.mubr.msk.f32.vlgmr.msra.gmra.mxu1 %vm320_vm5, %v644_v32 }
 0x7bf   :  { %4576 = vmatpush3.xpose.msk.msra.mxu1 %vm320_vm5, %v1223_v7  ;;  %4577 = vmatprep.mubr.msk.f32.mxu1 %vm4889_vm4, %v4888_v11 }
 0x7c0   :  { %4585 = vmatprep.subr.mxu1 %v4888_v11  ;;  %4561 = vmatpush3.msra.mxu0 %v5183_v10 }
 0x7c1   :  { %4570 = vmatprep.subr.mxu0 %v4888_v11 }
 0x7c2   :  { %4578 = vmatmul.mubr.msk.f32.vlgmr.msra.gmra.mxu1 %vm320_vm5, %v1221_v9 }
 0x7c3   :  { %4587 = vmatprep.mubr.msk.f32.mxu1 %vm4889_vm4, %v4888_v11 }
 0x87a   :  { %v976_v12 = vpop.f32.mrf.mxu1 }
 0x87c   :  { %v4559_v13 = vpop.f32.mrf.mxu1 }
 0x87e   :  { %v900_v15 = vpop.f32.mrf.mxu0  ;;  %v5188_v16 = vpop.f32.mrf.mxu1 }
 0x87f   :  { %4562 = vmatprep.mubr.msk.f32.mxu0 %vm320_vm5, %v900_v15 }
 0x880   :  { %v4554_v17 = vpop.f32.mrf.mxu0  ;;  %4563 = vmatmul.mubr.msk.f32.vlgmr.msra.gmra.mxu0 %vm320_vm5, %v976_v12  ;;  %v5192_v18 = vpop.f32.mrf.mxu1 }
 0x881   :  { %4571 = vmatpush3.xpose.msk.msra.mxu0 %vm320_vm5, %v1145_v14  ;;  %4572 = vmatprep.mubr.msk.f32.mxu0 %vm4889_vm4, %v4888_v11 }
 0x882   :  { %v1294_v19 = vpop.f32.mrf.mxu1  ;;  %4580 = vmatprep.subr.mxu0 %v4888_v11 }
 0x883   :  { %v1299_v21 = vmul.f32 0.35355338, %v1294_v19 }
 0x884   :  { %4573 = vmatmul.mubr.msk.f32.vlgmr.msra.gmra.mxu0 %vm320_vm5, %v1143_v20  ;;  %v4579_v24 = vpop.f32.mrf.mxu1 }
 0x885   :  { %v1303_v25 = vsel %vm320_vm5, %v1299_v21, -inf  ;;  %4582 = vmatprep.mubr.msk.f32.mxu0 %vm4889_vm4, %v4888_v11 }
 0x886   :  { %1304 = vmax.xlane.f32.xlu0 %v1303_v25 }
 0x90f   :  { %v1305_v26 = vpop.xlane.xlu0 %1304 }
 0x910   :  { %v1307_v27 = vsub.f32 %v1299_v21, %v1305_v26 }
 0x912   :  { %v1310_v28 = vmul.f32 1.442695, %v1307_v27 }
 0x914   :  { %4827 = vpow2.f32 %v1310_v28 }
 0x921   :  { %v4828_v35 = vpop.eup %4827 }
 0x922   :  { %v1315_v40 = vsel %vm320_vm5, %v4828_v35, 0.0 }
 0x940   :  { %v5202_v29 = vpop.f32.mrf.mxu0 }
 0x941   :  { %v1139_v14 = vadd.f32 %v5188_v16, %v5202_v29 }
 0x942   :  { %v5204_v30 = vpop.f32.mrf.mxu0 }
 0x943   :  { %v1134_v17 = vadd.f32 %v5192_v18, %v5204_v30 }
 0x944   :  { %v1216_v31 = vpop.f32.mrf.mxu0 }
 0x945   :  { %v1298_v32 = vmul.f32 0.35355338, %v1216_v31 }
 0x946   :  { %v4574_v33 = vpop.f32.mrf.mxu0 }
 0x947   :  { %v1300_v34 = vsel %vm320_vm5, %v1298_v32, -inf }
 0x948   :  { %1301 = vmax.xlane.f32.xlu1 %v1300_v34 }
 0x94c   :  { %1316 = vadd.xlane.f32.xlu1 %v1315_v40 }
 0x95d   :  { %1398 = vrot.lane.b32.xlu1 %v5095_v60, %s4897_s27 }
 0x961   :  { %1559 = vrot.lane.b32.xlu1 %v5090_v59, %s4898_s28 }
 0x965   :  { %1557 = vrot.lane.b32.xlu1 %v5090_v59, %s4899_s29 }
 0x9d1   :  { %v1302_v41 = vpop.xlane.xlu1 %1301 }
 0x9d2   :  { %v1306_v42 = vsub.f32 %v1298_v32, %v1302_v41 }
 0x9d4   :  { %v1308_v43 = vmul.f32 1.442695, %v1306_v42 }
 0x9d5   :  { %v1317_v44 = vpop.xlane.xlu1 %1316 }
 0x9d6   :  { %4829 = vpow2.f32 %v1308_v43 }
 0x9d7   :  { %4831 = vrcp.f32 %v1317_v44 }
 0x9d9   :  { %v1399_v45 = vpop.permute.xlu1 %1398 }
 0x9da   :  { %4586 = vmatpush3.msra.mxu1 %v1399_v45 }
 0x9db   :  { %4595 = vmatprep.subr.mxu1 %v4888_v11 }
 0x9dd   :  { %v1560_v50 = vpop.permute.xlu1 %1559 }
 0x9e1   :  { %v1558_v53 = vpop.permute.xlu1 %1557 }
 0x9e3   :  { %v4830_v46 = vpop.eup %4829 }
 0x9e4   :  { %v4832_v48 = vpop.eup %4831  ;;  %v1312_v51 = vsel %vm320_vm5, %v4830_v46, 0.0 }
 0x9e5   :  { %1313 = vadd.xlane.f32.xlu0 %v1312_v51  ;;  %v1321_v52 = vmul.f32 %v4832_v48, %v4828_v35 }
 0x9e7   :  { %4588 = vmatmul.mubr.msk.f32.vlgmr.msra.gmra.mxu1 %vm320_vm5, %v1321_v52 }
 0x9e8   :  { %4596 = vmatpush3.xpose.msk.msra.mxu1 %vm320_vm5, %v1560_v50  ;;  %4597 = vmatprep.mubr.msk.f32.mxu1 %vm4889_vm4, %v4888_v11  ;;  %v5274_v50 = vld [vmem:[%s5685_s8] ss:$0 sm:$0xff] }
 0x9e9   :  { %4605 = vmatprep.subr.mxu1 %v4888_v11 }
 0x9eb   :  { %4598 = vmatmul.mubr.msk.f32.vlgmr.msra.gmra.mxu1 %vm320_vm5, %v1558_v53 }
 0x9ec   :  { %4607 = vmatprep.mubr.msk.f32.mxu1 %vm4889_vm4, %v4888_v11 }
 0x9fb   :  { %1322 = vrot.lane.b32.xlu0 %v5090_v59, %s4897_s27 }
 0x9ff   :  { %1637 = vrot.lane.b32.xlu0 %v5095_v60, %s4898_s28 }
 0xa03   :  { %1635 = vrot.lane.b32.xlu0 %v5095_v60, %s4899_s29 }
 0xa6e   :  { %v1314_v54 = vpop.xlane.xlu0 %1313 }
 0xa6f   :  { %4833 = vrcp.f32 %v1314_v54 }
 0xa72   :  { %v1323_v55 = vpop.permute.xlu0 %1322 }
 0xa73   :  { %4581 = vmatpush3.msra.mxu0 %v1323_v55 }
 0xa74   :  { %4590 = vmatprep.subr.mxu0 %v5235_v4 }
 0xa76   :  { %v1638_v5 = vpop.permute.xlu0 %1637 }
 0xa7a   :  { %v1636_v8 = vpop.permute.xlu0 %1635 }
 0xa7c   :  { %v4834_v56 = vpop.eup %4833 }
 0xa7d   :  { %v1319_v58 = vmul.f32 %v4834_v56, %v4830_v46 }
 0xa7f   :  { %4583 = vmatmul.mubr.msk.f32.vlgmr.msra.gmra.mxu0 %vm320_vm5, %v1319_v58 }
 0xa80   :  { %4591 = vmatpush3.msra.mxu0 %v5235_v4 }
 0xa81   :  { %4600 = vmatprep.subr.mxu0 %v4888_v11 }
 0xaa7   :  { %v1470_v61 = vpop.f32.mrf.mxu1 }
 0xaa9   :  { %v4589_v62 = vpop.f32.mrf.mxu1 }
 0xaab   :  { %v1631_v63 = vpop.f32.mrf.mxu1 }
 0xaac   :  { %v1713_v1 = vmul.f32 0.35355338, %v1631_v63 }
 0xaad   :  { %v4599_v2 = vpop.f32.mrf.mxu1 }
 0xaae   :  { %v1715_v3 = vsel %vm320_vm5, %v1713_v1, -inf }
 0xaaf   :  { %1716 = vmax.xlane.f32.xlu1 %v1715_v3 }
 0xb38   :  { %v1717_v9 = vpop.xlane.xlu1 %1716 }
 0xb39   :  { %v1721_v12 = vsub.f32 %v1713_v1, %v1717_v9 }
 0xb3b   :  { %v1723_v13 = vmul.f32 1.442695, %v1721_v12  ;;  %v5295_v12 = vld [vmem:[%s5686_s11 + $0x18] sm:$0xff] }
 0xb3d   :  { %4835 = vpow2.f32 %v1723_v13  ;;  %v5300_v13 = vld [vmem:[%s5686_s11 + $0x10] sm:$0xff] }
 0xb3f   :  { %v1394_v6 = vpop.f32.mrf.mxu0 }
 0xb40   :  { %4592 = vmatprep.mubr.msk.f32.mxu0 %vm320_vm5, %v1394_v6 }
 0xb41   :  { %v4584_v7 = vpop.f32.mrf.mxu0  ;;  %4593 = vmatmul.mubr.msk.f32.vlgmr.msra.gmra.mxu0 %vm320_vm5, %v1470_v61 }
 0xb42   :  { %4601 = vmatpush3.xpose.msk.msra.mxu0 %vm320_vm5, %v1638_v5  ;;  %4602 = vmatprep.mubr.msk.f32.mxu0 %vm4889_vm4, %v4888_v11 }
 0xb43   :  { %4610 = vmatprep.subr.mxu0 %v4888_v11 }
 0xb45   :  { %4603 = vmatmul.mubr.msk.f32.vlgmr.msra.gmra.mxu0 %vm320_vm5, %v1636_v8 }
 0xb46   :  { %4612 = vmatprep.mubr.msk.f32.mxu0 %vm4889_vm4, %v4888_v11 }
 0xb4a   :  { %v4836_v28 = vpop.eup %4835 }
 0xb4b   :  { %v1727_v31 = vsel %vm320_vm5, %v4836_v28, 0.0 }
 0xc01   :  { %v4594_v15 = vpop.f32.mrf.mxu0 }
 0xc02   :  { %v1556_v19 = vadd.f32 %v4594_v15, %v1139_v14  ;;  %v5307_v14 = vld [vmem:[%s5686_s11 + $0x8] sm:$0xff]  ;;  %v5314_v15 = vld [vmem:[%s5686_s11] sm:$0xff] }
 0xc03   :  { %v1546_v20 = vpop.f32.mrf.mxu0 }
 0xc04   :  { %v1555_v21 = vadd.f32 %v1546_v20, %v1134_v17  ;;  %v5323_v17 = vld [vmem:[%s5687_s13 + $0x38] sm:$0xff]  ;;  %v5336_v20 = vld [vmem:[%s5687_s13 + $0x28] sm:$0xff] }
 0xc05   :  { %v1709_v24 = vpop.f32.mrf.mxu0 }
 0xc06   :  { %v1714_v25 = vmul.f32 0.35355338, %v1709_v24 }
 0xc07   :  { %v4604_v26 = vpop.f32.mrf.mxu0 }
 0xc08   :  { %v1718_v27 = vsel %vm320_vm5, %v1714_v25, -inf }
 0xc09   :  { %1719 = vmax.xlane.f32.xlu0 %v1718_v27 }
 0xc0d   :  { %1728 = vadd.xlane.f32.xlu0 %v1727_v31 }
 0xc23   :  { %1737 = vrot.lane.b32.xlu0 %v5090_v59, %s4900_s0  ;;  %v5264_v59 = vld [vmem:[%s5684_s7 + $0x18] sm:$0xff] }
 0xc92   :  { %v1720_v16 = vpop.xlane.xlu0 %1719 }
 0xc93   :  { %v1722_v29 = vsub.f32 %v1714_v25, %v1720_v16 }
 0xc95   :  { %v1725_v18 = vmul.f32 1.442695, %v1722_v29 }
 0xc96   :  { %v1729_v30 = vpop.xlane.xlu0 %1728 }
 0xc97   :  { %4837 = vpow2.f32 %v1725_v18  ;;  %v5352_v18 = vld [vmem:[%s5688_s9] ss:$0 sm:$0xff] }
 0xc98   :  { %4839 = vrcp.f32 %v1729_v30 }
 0xc9a   :  { %v1738_v32 = vpop.permute.xlu0 %1737 }
 0xc9b   :  { %4606 = vmatpush3.msra.mxu1 %v1738_v32 }
 0xc9c   :  { %4615 = vmatprep.subr.mxu1 %v5264_v59 }
 0xca4   :  { %v4838_v33 = vpop.eup %4837 }
 0xca5   :  { %v4840_v34 = vpop.eup %4839  ;;  %v1730_v35 = vsel %vm320_vm5, %v4838_v33, 0.0 }
 0xca6   :  { %1731 = vadd.xlane.f32.xlu1 %v1730_v35  ;;  %v1734_v40 = vmul.f32 %v4840_v34, %v4836_v28  ;;  %v5358_v34 = vld [vmem:[%s5689_s10] ss:$0 sm:$0xff] }
 0xca8   :  { %4608 = vmatmul.mubr.msk.f32.vlgmr.msra.gmra.mxu1 %vm320_vm5, %v1734_v40 }
 0xca9   :  { %4616 = vmatpush3.msra.mxu1 %v5264_v59 }
 0xcaa   :  { %4631 = vmatprep.subr.mxu1 %v5323_v17 }
 0xcb7   :  { %1813 = vrot.lane.b32.xlu1 %v5095_v60, %s4900_s0 }
 0xd2f   :  { %v1732_v41 = vpop.xlane.xlu1 %1731 }
 0xd30   :  { %4841 = vrcp.f32 %v1732_v41 }
 0xd33   :  { %v1814_v42 = vpop.permute.xlu1 %1813 }
 0xd34   :  { %4611 = vmatpush3.msra.mxu0 %v1814_v42  ;;  %v5376_v42 = vld [vmem:[%s5687_s13 + $0x18] sm:$0xff] }
 0xd35   :  { %4620 = vmatprep.subr.mxu0 %v5295_v12 }
 0xd3d   :  { %v4842_v43 = vpop.eup %4841 }
 0xd3e   :  { %v1736_v44 = vmul.f32 %v4842_v43, %v4838_v33 }
 0xd40   :  { %4613 = vmatmul.mubr.msk.f32.vlgmr.msra.gmra.mxu0 %vm320_vm5, %v1736_v44 }
 0xd41   :  { %4621 = vmatpush3.msra.mxu0 %v5295_v12 }
 0xd42   :  { %4622 = vmatprep.subr.mxu0 %v5300_v13 }
 0xd43   :  { %4623 = vmatpush3.msra.mxu0 %v5300_v13 }
 0xd44   :  { %4624 = vmatprep.subr.mxu0 %v5307_v14 }
 0xd45   :  { %4625 = vmatpush3.msra.mxu0 %v5307_v14 }
 0xd46   :  { %4626 = vmatprep.subr.mxu0 %v5314_v15 }
 0xd47   :  { %4627 = vmatpush3.msra.mxu0 %v5314_v15 }
 0xd48   :  { %4650 = vmatprep.subr.mxu0 %v5038_v36 }
 0xd68   :  { %v1809_v45 = vpop.f32.mrf.mxu1 }
 0xd69   :  { %4617 = vmatprep.mubr.msk.f32.mxu1 %vm320_vm5, %v1809_v45 }
 0xd6a   :  { %v4609_v60 = vpop.f32.mrf.mxu1 }
 0xe00   :  { %v1885_v46 = vpop.f32.mrf.mxu0 }
 0xe01   :  { %4618 = vmatmul.mubr.msk.f32.vlgmr.msra.gmra.mxu1 %vm320_vm5, %v1885_v46 }
 0xe02   :  { %v4614_v48 = vpop.f32.mrf.mxu0  ;;  %4632 = vmatpush3.msra.mxu1 %v5323_v17 }
 0xec1   :  { %v4619_v51 = vpop.f32.mrf.mxu1 }
 0xec2   :  { %v1971_v52 = vadd.f32 %v4619_v51, %v1556_v19  ;;  %v5328_v19 = vld [vmem:[%s5687_s13 + $0x30] sm:$0xff]  ;;  %v5416_v51 = vld [vmem:[%s5691_s14] ss:$0 sm:$0xff] }
 0xec3   :  { %v1961_v53 = vpop.f32.mrf.mxu1  ;;  %4633 = vmatprep.subr.mxu1 %v5328_v19 }
 0xec4   :  { %v1979_v54 = vadd.f32 %v5274_v50, %v1971_v52  ;;  %v1970_v55 = vadd.f32 %v1961_v53, %v1555_v21  ;;  %4634 = vmatpush3.msra.mxu1 %v5328_v19  ;;  %v5343_v21 = vld [vmem:[%s5687_s13 + $0x20] sm:$0xff] }
 0xec5   :  { %4635 = vmatprep.subr.mxu1 %v5336_v20 }
 0xec6   :  { %v5278_v56 = vadd.f32 %v1979_v54, %v5025_v23  ;;  %v1978_v58 = vadd.f32 %v5274_v50, %v1970_v55  ;;  %4636 = vmatpush3.msra.mxu1 %v5336_v20 }
 0xec7   :  { %4637 = vmatprep.subr.mxu1 %v5343_v21 }
 0xec8   :  { %v5282_v61 = vadd.f32 %v1978_v58, %v5023_v22  ;;  %v1985_v62 = vsel %vm186_vm3, %v5278_v56, 0.0  ;;  %4638 = vmatpush3.msra.mxu1 %v5343_v21 }
 0xec9   :  { %1986 = vadd.xlane.f32.xlu0 %v1985_v62  ;;  %4639 = vmatprep.subr.mxu1 %v5376_v42 }
 0xeca   :  { %v1982_v63 = vsel %vm186_vm3, %v5282_v61, 0.0  ;;  %4640 = vmatpush3.msra.mxu1 %v5376_v42 }
 0xecb   :  { %1983 = vadd.xlane.f32.xlu1 %v1982_v63 }
 0xf52   :  { %v1987_v1 = vpop.xlane.xlu0 %1986 }
 0xf53   :  { %v1989_v2 = vmul.f32 0.03125, %v1987_v1 }
 0xf54   :  { %v1984_v3 = vpop.xlane.xlu1 %1983 }
 0xf55   :  { %v1991_v5 = vsub.f32 %v5278_v56, %v1989_v2  ;;  %v1988_v23 = vmul.f32 0.03125, %v1984_v3 }
 0xf57   :  { %v1990_v6 = vsub.f32 %v5282_v61, %v1988_v23  ;;  %v1993_v7 = vmul.f32 %v1991_v5, %v1991_v5 }
 0xf59   :  { %v1997_v22 = vsel %vm186_vm3, %v1993_v7, 0.0  ;;  %v1992_v8 = vmul.f32 %v1990_v6, %v1990_v6 }
 0xf5a   :  { %1998 = vadd.xlane.f32.xlu1 %v1997_v22 }
 0xf5b   :  { %v1994_v9 = vsel %vm186_vm3, %v1992_v8, 0.0 }
 0xf5c   :  { %1995 = vadd.xlane.f32.xlu0 %v1994_v9 }
 0xfe3   :  { %v1999_v24 = vpop.xlane.xlu1 %1998 }
 0xfe4   :  { %v2001_v25 = vmul.f32 0.03125, %v1999_v24 }
 0xfe5   :  { %v1996_v26 = vpop.xlane.xlu0 %1995 }
 0xfe6   :  { %v2003_v27 = vadd.f32 1e-05, %v2001_v25  ;;  %v2000_v28 = vmul.f32 0.03125, %v1996_v26 }
 0xfe8   :  { %4843 = vrsqrt.f32 %v2003_v27  ;;  %v2002_v31 = vadd.f32 1e-05, %v2000_v28 }
 0xfea   :  { %4845 = vrsqrt.f32 %v2002_v31 }
 0xff5   :  { %v4844_v16 = vpop.eup %4843 }
 0xff6   :  { %v2007_v29 = vmul.f32 %v4844_v16, %v1991_v5 }
 0xff7   :  { %v4846_v30 = vpop.eup %4845 }
 0xff8   :  { %v2006_v32 = vmul.f32 %v4846_v30, %v1990_v6  ;;  %v2015_v33 = vmul.f32 %v5352_v18, %v2007_v29 }
 0xffa   :  { %v2014_v35 = vmul.f32 %v5352_v18, %v2006_v32  ;;  %v2023_v41 = vadd.f32 %v5358_v34, %v2015_v33 }
 0xffc   :  { %v2022_v40 = vadd.f32 %v5358_v34, %v2014_v35 }
 0xffe   :  { %4628 = vmatprep.mubr.msk.f32.mxu0 %vm186_vm3, %v2022_v40 }
 0xfff   :  { %4629 = vmatmul.mubr.msk.f32.vlgmr.msra.gmra.mxu0 %vm186_vm3, %v2023_v41 }
0x1000   :  { %4651 = vmatpush3.msra.mxu0 %v5038_v36  ;;  %v5383_v36 = vld [vmem:[%s5687_s13 + $0x10] sm:$0xff] }
0x1001   :  { %4652 = vmatprep.subr.mxu0 %v5043_v37  ;;  %4641 = vmatprep.subr.mxu1 %v5383_v36 }
0x1002   :  { %4653 = vmatpush3.msra.mxu0 %v5043_v37  ;;  %4642 = vmatpush3.msra.mxu1 %v5383_v36  ;;  %v5390_v37 = vld [vmem:[%s5687_s13 + $0x8] sm:$0xff] }
0x1003   :  { %4654 = vmatprep.subr.mxu0 %v5050_v38  ;;  %4643 = vmatprep.subr.mxu1 %v5390_v37 }
0x1004   :  { %4655 = vmatpush3.msra.mxu0 %v5050_v38  ;;  %v5395_v38 = vld [vmem:[%s5687_s13] sm:$0xff]  ;;  %4644 = vmatpush3.msra.mxu1 %v5390_v37 }
0x1005   :  { %4656 = vmatprep.subr.mxu0 %v5059_v39  ;;  %4645 = vmatprep.subr.mxu1 %v5395_v38 }
0x1006   :  { %4657 = vmatpush3.msra.mxu0 %v5059_v39  ;;  %4646 = vmatpush3.msra.mxu1 %v5395_v38  ;;  %v5405_v39 = vld [vmem:[%s5690_s12] ss:$0 sm:$0xff]  ;;  %s4901_s12 = smov 32  }
0x1007   :  { %4661 = vmatprep.subr.mxu0 %v4888_v11  ;;  %4666 = vmatprep.subr.mxu1 %v4888_v11 }
0x10bf   :  { %v4630_v43 = vpop.f32.mrf.mxu0 }
0x10c0   :  { %v2108_v44 = vadd.f32 %v4630_v43, %v5405_v39 }
0x10c1   :  { %v2102_v45 = vpop.f32.mrf.mxu0 }
0x10c2   :  { %v2103_v60 = vadd.f32 %v5405_v39, %v2102_v45  ;;  %v2112_v48 = vmax.f32 %v2108_v44, 0.0 }
0x10c4   :  { %v2111_v46 = vmax.f32 %v2103_v60, 0.0 }
0x10c6   :  { %4647 = vmatprep.mubr.msk.f32.mxu1 %vm76_vm0, %v2111_v46 }
0x10c7   :  { %4648 = vmatmul.mubr.msk.f32.vlgmr.msra.gmra.mxu1 %vm76_vm0, %v2112_v48 }
0x10c8   :  { %4668 = vmatprep.mubr.msk.f32.mxu1 %vm4889_vm4, %v4888_v11 }
0x1187   :  { %v4649_v52 = vpop.f32.mrf.mxu1 }
0x1188   :  { %v2197_v53 = vadd.f32 %v4649_v52, %v5416_v51 }
0x1189   :  { %v2191_v54 = vpop.f32.mrf.mxu1 }
0x118a   :  { %v5420_v55 = vadd.f32 %v2197_v53, %v5278_v56  ;;  %v2192_v58 = vadd.f32 %v5416_v51, %v2191_v54 }
0x118c   :  { %v5424_v62 = vadd.f32 %v2192_v58, %v5282_v61  ;;  %v2205_v63 = vsel %vm186_vm3, %v5420_v55, 0.0 }
0x118d   :  { %2206 = vadd.xlane.f32.xlu1 %v2205_v63 }
0x118e   :  { %v2202_v1 = vsel %vm186_vm3, %v5424_v62, 0.0 }
0x118f   :  { %2203 = vadd.xlane.f32.xlu0 %v2202_v1 }
0x1216   :  { %v2207_v2 = vpop.xlane.xlu1 %2206 }
0x1217   :  { %v2209_v3 = vmul.f32 0.03125, %v2207_v2 }
0x1218   :  { %v2204_v5 = vpop.xlane.xlu0 %2203 }
0x1219   :  { %v2211_v23 = vsub.f32 %v5420_v55, %v2209_v3  ;;  %v2208_v56 = vmul.f32 0.03125, %v2204_v5 }
0x121b   :  { %v2210_v6 = vsub.f32 %v5424_v62, %v2208_v56  ;;  %v2213_v7 = vmul.f32 %v2211_v23, %v2211_v23 }
0x121d   :  { %v2217_v61 = vsel %vm186_vm3, %v2213_v7, 0.0  ;;  %v2212_v22 = vmul.f32 %v2210_v6, %v2210_v6 }
0x121e   :  { %2218 = vadd.xlane.f32.xlu1 %v2217_v61 }
0x121f   :  { %v2214_v8 = vsel %vm186_vm3, %v2212_v22, 0.0 }
0x1220   :  { %2215 = vadd.xlane.f32.xlu0 %v2214_v8 }
0x12a7   :  { %v2219_v9 = vpop.xlane.xlu1 %2218 }
0x12a8   :  { %v2221_v24 = vmul.f32 0.03125, %v2219_v9 }
0x12a9   :  { %v2216_v25 = vpop.xlane.xlu0 %2215 }
0x12aa   :  { %v2223_v26 = vadd.f32 1e-05, %v2221_v24  ;;  %v2220_v27 = vmul.f32 0.03125, %v2216_v25 }
0x12ac   :  { %4847 = vrsqrt.f32 %v2223_v26  ;;  %v2222_v28 = vadd.f32 1e-05, %v2220_v27 }
0x12ae   :  { %4849 = vrsqrt.f32 %v2222_v28 }
0x12b9   :  { %v4848_v31 = vpop.eup %4847 }
0x12ba   :  { %v2227_v16 = vmul.f32 %v4848_v31, %v2211_v23 }
0x12bb   :  { %v4850_v29 = vpop.eup %4849 }
0x12bc   :  { %v2226_v30 = vmul.f32 %v4850_v29, %v2210_v6  ;;  %v2229_v32 = vmul.f32 %v5067_v47, %v2227_v16 }
0x12be   :  { %v2228_v33 = vmul.f32 %v5067_v47, %v2226_v30  ;;  %v2231_v40 = vadd.f32 %v5072_v49, %v2229_v32 }
0x12c0   :  { %v2230_v35 = vadd.f32 %v5072_v49, %v2228_v33 }
0x12c2   :  { %4658 = vmatprep.mubr.msk.f32.mxu0 %vm186_vm3, %v2230_v35 }
0x12c3   :  { %4659 = vmatmul.mubr.msk.f32.vlgmr.msra.gmra.mxu0 %vm186_vm3, %v2231_v40 }
0x12c4   :  { %4663 = vmatprep.mubr.msk.f32.mxu0 %vm4889_vm4, %v4888_v11 }
0x1383   :  { %v4660_v41 = vpop.f32.mrf.mxu0 }
0x1384   :  { %v5443_v43 = vadd.f32 %v4660_v41, %v5087_v57 }
0x1385   :  { %v2304_v44 = vpop.f32.mrf.mxu0 }
0x1386   :  { %v5446_v45 = vadd.f32 %v5087_v57, %v2304_v44  ;;  %2391 = vrot.lane.b32.xlu1 %v5443_v43, %s4890_s19 }
0x1388   :  { %2314 = vrot.lane.b32.xlu0 %v5446_v45, %s4890_s19 }
0x13f8   :  { %v2392_v47 = vpop.permute.xlu1 %2391 }
0x13f9   :  { %4667 = vmatpush3.xpose.msk.msra.mxu1 %vm320_vm5, %v2392_v47 }
0x13fa   :  { %v2315_v49 = vpop.permute.xlu0 %2314  ;;  %4676 = vmatprep.subr.mxu1 %v4888_v11 }
0x13fb   :  { %4662 = vmatpush3.xpose.msk.msra.mxu0 %vm320_vm5, %v2315_v49 }
0x13fc   :  { %4669 = vmatmul.mubr.msk.f32.vlgmr.msra.gmra.mxu1 %vm320_vm5, %v5443_v43  ;;  %4671 = vmatprep.subr.mxu0 %v4888_v11 }
0x13fd   :  { %4678 = vmatprep.mubr.msk.f32.mxu1 %vm4889_vm4, %v4888_v11 }
0x13fe   :  { %4664 = vmatmul.mubr.msk.f32.vlgmr.msra.gmra.mxu0 %vm320_vm5, %v5446_v45 }
0x13ff   :  { %4673 = vmatprep.mubr.msk.f32.mxu0 %vm4889_vm4, %v4888_v11 }
0x14bc   :  { %v2463_v57 = vpop.f32.mrf.mxu1 }
0x14bd   :  { %v2468_v60 = vmul.f32 0.35355338, %v2463_v57 }
0x14be   :  { %v2386_v46 = vpop.f32.mrf.mxu0  ;;  %v4670_v48 = vpop.f32.mrf.mxu1 }
0x14bf   :  { %v2467_v52 = vmul.f32 0.35355338, %v2386_v46  ;;  %v2472_v53 = vsel %vm320_vm5, %v2468_v60, -inf }
0x14c0   :  { %2473 = vmax.xlane.f32.xlu0 %v2472_v53  ;;  %v4665_v54 = vpop.f32.mrf.mxu0 }
0x14c1   :  { %v2469_v58 = vsel %vm320_vm5, %v2467_v52, -inf }
0x14c2   :  { %2470 = vmax.xlane.f32.xlu1 %v2469_v58 }
0x14d3   :  { %2567 = vrot.lane.b32.xlu1 %v5443_v43, %s4891_s6 }
0x14d6   :  { %2491 = vrot.lane.b32.xlu0 %v5446_v45, %s4891_s6 }
0x14d7   :  { %2645 = vrot.lane.b32.xlu1 %v5446_v45, %s4892_s20 }
0x1549   :  { %v2474_v63 = vpop.xlane.xlu0 %2473 }
0x154a   :  { %v2476_v1 = vsub.f32 %v2468_v60, %v2474_v63 }
0x154b   :  { %v2471_v2 = vpop.xlane.xlu1 %2470 }
0x154c   :  { %v2479_v3 = vmul.f32 1.442695, %v2476_v1  ;;  %v2475_v5 = vsub.f32 %v2467_v52, %v2471_v2 }
0x154d   :  { %v2492_v23 = vpop.permute.xlu0 %2491 }
0x154e   :  { %4851 = vpow2.f32 %v2479_v3  ;;  %v2477_v56 = vmul.f32 1.442695, %v2475_v5  ;;  %4672 = vmatpush3.msra.mxu0 %v2492_v23 }
0x154f   :  { %v2568_v6 = vpop.permute.xlu1 %2567  ;;  %4681 = vmatprep.subr.mxu0 %v4888_v11 }
0x1550   :  { %4853 = vpow2.f32 %v2477_v56  ;;  %4677 = vmatpush3.msra.mxu1 %v2568_v6 }
0x1551   :  { %4686 = vmatprep.subr.mxu1 %v4888_v11 }
0x1553   :  { %v2646_v9 = vpop.permute.xlu1 %2645 }
0x155b   :  { %v4852_v7 = vpop.eup %4851 }
0x155c   :  { %v2484_v61 = vsel %vm320_vm5, %v4852_v7, 0.0 }
0x155d   :  { %v4854_v22 = vpop.eup %4853  ;;  %2485 = vadd.xlane.f32.xlu1 %v2484_v61 }
0x155e   :  { %v2481_v8 = vsel %vm320_vm5, %v4854_v22, 0.0 }
0x155f   :  { %2482 = vadd.xlane.f32.xlu0 %v2481_v8 }
0x156e   :  { %2643 = vrot.lane.b32.xlu1 %v5446_v45, %s4893_s21 }
0x1575   :  { %2723 = vrot.lane.b32.xlu0 %v5443_v43, %s4892_s20 }
0x1579   :  { %2721 = vrot.lane.b32.xlu0 %v5443_v43, %s4893_s21 }
0x15e6   :  { %v2486_v24 = vpop.xlane.xlu1 %2485 }
0x15e7   :  { %4855 = vrcp.f32 %v2486_v24 }
0x15e8   :  { %v2483_v25 = vpop.xlane.xlu0 %2482 }
0x15e9   :  { %4857 = vrcp.f32 %v2483_v25 }
0x15ea   :  { %v2644_v30 = vpop.permute.xlu1 %2643 }
0x15ec   :  { %v2724_v27 = vpop.permute.xlu0 %2723 }
0x15f0   :  { %v2722_v29 = vpop.permute.xlu0 %2721 }
0x15f4   :  { %v4856_v26 = vpop.eup %4855 }
0x15f5   :  { %v2490_v28 = vmul.f32 %v4856_v26, %v4852_v7 }
0x15f6   :  { %v4858_v31 = vpop.eup %4857 }
0x15f7   :  { %4679 = vmatmul.mubr.msk.f32.vlgmr.msra.gmra.mxu1 %vm320_vm5, %v2490_v28  ;;  %v2488_v16 = vmul.f32 %v4858_v31, %v4854_v22 }
0x15f8   :  { %4687 = vmatpush3.xpose.msk.msra.mxu1 %vm320_vm5, %v2724_v27  ;;  %4688 = vmatprep.mubr.msk.f32.mxu1 %vm4889_vm4, %v4888_v11 }
0x15f9   :  { %4674 = vmatmul.mubr.msk.f32.vlgmr.msra.gmra.mxu0 %vm320_vm5, %v2488_v16  ;;  %4696 = vmatprep.subr.mxu1 %v4888_v11 }
0x15fa   :  { %4682 = vmatpush3.xpose.msk.msra.mxu0 %vm320_vm5, %v2646_v9  ;;  %4683 = vmatprep.mubr.msk.f32.mxu0 %vm4889_vm4, %v4888_v11 }
0x15fb   :  { %4689 = vmatmul.mubr.msk.f32.vlgmr.msra.gmra.mxu1 %vm320_vm5, %v2722_v29  ;;  %4691 = vmatprep.subr.mxu0 %v4888_v11 }
0x15fc   :  { %4698 = vmatprep.mubr.msk.f32.mxu1 %vm4889_vm4, %v4888_v11 }
0x15fd   :  { %4684 = vmatmul.mubr.msk.f32.vlgmr.msra.gmra.mxu0 %vm320_vm5, %v2644_v30 }
0x15fe   :  { %4693 = vmatprep.mubr.msk.f32.mxu0 %vm4889_vm4, %v4888_v11 }
0x16b7   :  { %v2639_v32 = vpop.f32.mrf.mxu1 }
0x16b9   :  { %v2563_v33 = vpop.f32.mrf.mxu0  ;;  %v4680_v35 = vpop.f32.mrf.mxu1 }
0x16bb   :  { %v4675_v40 = vpop.f32.mrf.mxu0  ;;  %v2795_v41 = vpop.f32.mrf.mxu1 }
0x16bc   :  { %v2800_v44 = vmul.f32 0.35355338, %v2795_v41 }
0x16bd   :  { %v2717_v47 = vpop.f32.mrf.mxu0  ;;  %v4690_v49 = vpop.f32.mrf.mxu1 }
0x16be   :  { %v2799_v57 = vmul.f32 0.35355338, %v2717_v47  ;;  %v2804_v60 = vsel %vm320_vm5, %v2800_v44, -inf }
0x16bf   :  { %v4685_v46 = vpop.f32.mrf.mxu0  ;;  %2805 = vmax.xlane.f32.xlu0 %v2804_v60 }
0x16c0   :  { %v2801_v48 = vsel %vm320_vm5, %v2799_v57, -inf }
0x16c1   :  { %2802 = vmax.xlane.f32.xlu1 %v2801_v48 }
0x1748   :  { %v2806_v52 = vpop.xlane.xlu0 %2805 }
0x1749   :  { %v2808_v53 = vsub.f32 %v2800_v44, %v2806_v52 }
0x174a   :  { %v2803_v54 = vpop.xlane.xlu1 %2802 }
0x174b   :  { %v2811_v58 = vmul.f32 1.442695, %v2808_v53  ;;  %v2807_v63 = vsub.f32 %v2799_v57, %v2803_v54 }
0x174d   :  { %4859 = vpow2.f32 %v2811_v58  ;;  %v2809_v1 = vmul.f32 1.442695, %v2807_v63 }
0x174f   :  { %4861 = vpow2.f32 %v2809_v1 }
0x175a   :  { %v4860_v2 = vpop.eup %4859 }
0x175b   :  { %v2816_v3 = vsel %vm320_vm5, %v4860_v2, 0.0 }
0x175c   :  { %v4862_v5 = vpop.eup %4861  ;;  %2817 = vadd.xlane.f32.xlu1 %v2816_v3 }
0x175d   :  { %v2813_v23 = vsel %vm320_vm5, %v4862_v5, 0.0 }
0x175e   :  { %2814 = vadd.xlane.f32.xlu0 %v2813_v23 }
0x176d   :  { %2899 = vrot.lane.b32.xlu1 %v5443_v43, %s4894_s1 }
0x1771   :  { %3139 = vrot.lane.b32.xlu1 %v5446_v45, %s4895_s22 }
0x1774   :  { %2823 = vrot.lane.b32.xlu0 %v5446_v45, %s4894_s1 }
0x1775   :  { %3137 = vrot.lane.b32.xlu1 %v5446_v45, %s4896_s23 }
0x1778   :  { %3217 = vrot.lane.b32.xlu0 %v5443_v43, %s4895_s22 }
0x177c   :  { %3215 = vrot.lane.b32.xlu0 %v5443_v43, %s4896_s23 }
0x17e5   :  { %v2818_v56 = vpop.xlane.xlu1 %2817 }
0x17e6   :  { %4863 = vrcp.f32 %v2818_v56 }
0x17e7   :  { %v2815_v6 = vpop.xlane.xlu0 %2814 }
0x17e8   :  { %4865 = vrcp.f32 %v2815_v6 }
0x17e9   :  { %v2900_v7 = vpop.permute.xlu1 %2899 }
0x17ea   :  { %4697 = vmatpush3.msra.mxu1 %v2900_v7 }
0x17eb   :  { %v2824_v61 = vpop.permute.xlu0 %2823  ;;  %4706 = vmatprep.subr.mxu1 %v5164_v0 }
0x17ec   :  { %4692 = vmatpush3.msra.mxu0 %v2824_v61 }
0x17ed   :  { %4701 = vmatprep.subr.mxu0 %v5183_v10  ;;  %v3140_v27 = vpop.permute.xlu1 %3139 }
0x17ef   :  { %v3218_v25 = vpop.permute.xlu0 %3217 }
0x17f1   :  { %v3138_v30 = vpop.permute.xlu1 %3137 }
0x17f3   :  { %v4864_v22 = vpop.eup %4863  ;;  %v3216_v26 = vpop.permute.xlu0 %3215 }
0x17f4   :  { %v2822_v8 = vmul.f32 %v4864_v22, %v4860_v2 }
0x17f5   :  { %v4866_v9 = vpop.eup %4865 }
0x17f6   :  { %4699 = vmatmul.mubr.msk.f32.vlgmr.msra.gmra.mxu1 %vm320_vm5, %v2822_v8  ;;  %v2820_v24 = vmul.f32 %v4866_v9, %v4862_v5 }
0x17f7   :  { %4708 = vmatprep.mubr.msk.f32.mxu1 %vm320_vm5, %v2563_v33  ;;  %4707 = vmatpush3.msra.mxu1 %v5164_v0 }
0x17f8   :  { %4694 = vmatmul.mubr.msk.f32.vlgmr.msra.gmra.mxu0 %vm320_vm5, %v2820_v24  ;;  %4716 = vmatprep.subr.mxu1 %v4888_v11 }
0x17f9   :  { %4702 = vmatpush3.msra.mxu0 %v5183_v10 }
0x17fa   :  { %4709 = vmatmul.mubr.msk.f32.vlgmr.msra.gmra.mxu1 %vm320_vm5, %v2639_v32  ;;  %4711 = vmatprep.subr.mxu0 %v4888_v11 }
0x17fb   :  { %4717 = vmatpush3.xpose.msk.msra.mxu1 %vm320_vm5, %v3218_v25  ;;  %4718 = vmatprep.mubr.msk.f32.mxu1 %vm4889_vm4, %v4888_v11 }
0x17fc   :  { %4726 = vmatprep.subr.mxu1 %v4888_v11 }
0x17fe   :  { %4719 = vmatmul.mubr.msk.f32.vlgmr.msra.gmra.mxu1 %vm320_vm5, %v3216_v26 }
0x17ff   :  { %4728 = vmatprep.mubr.msk.f32.mxu1 %vm4889_vm4, %v4888_v11 }
0x18b6   :  { %v2971_v0 = vpop.f32.mrf.mxu1 }
0x18b8   :  { %v2895_v10 = vpop.f32.mrf.mxu0  ;;  %v4700_v28 = vpop.f32.mrf.mxu1 }
0x18b9   :  { %4703 = vmatprep.mubr.msk.f32.mxu0 %vm320_vm5, %v2895_v10 }
0x18ba   :  { %v4695_v31 = vpop.f32.mrf.mxu0  ;;  %4704 = vmatmul.mubr.msk.f32.vlgmr.msra.gmra.mxu0 %vm320_vm5, %v2971_v0  ;;  %v5533_v16 = vpop.f32.mrf.mxu1 }
0x18bb   :  { %4712 = vmatpush3.xpose.msk.msra.mxu0 %vm320_vm5, %v3140_v27  ;;  %4713 = vmatprep.mubr.msk.f32.mxu0 %vm4889_vm4, %v4888_v11 }
0x18bc   :  { %v5538_v29 = vpop.f32.mrf.mxu1  ;;  %4721 = vmatprep.subr.mxu0 %v4888_v11 }
0x18be   :  { %4714 = vmatmul.mubr.msk.f32.vlgmr.msra.gmra.mxu0 %vm320_vm5, %v3138_v30  ;;  %v3289_v32 = vpop.f32.mrf.mxu1 }
0x18bf   :  { %v3294_v33 = vmul.f32 0.35355338, %v3289_v32  ;;  %4723 = vmatprep.mubr.msk.f32.mxu0 %vm4889_vm4, %v4888_v11 }
0x18c0   :  { %v4720_v35 = vpop.f32.mrf.mxu1 }
0x18c1   :  { %v3298_v40 = vsel %vm320_vm5, %v3294_v33, -inf }
0x18c2   :  { %3299 = vmax.xlane.f32.xlu0 %v3298_v40 }
0x194b   :  { %v3300_v41 = vpop.xlane.xlu0 %3299 }
0x194c   :  { %v3302_v44 = vsub.f32 %v3294_v33, %v3300_v41 }
0x194e   :  { %v3305_v47 = vmul.f32 1.442695, %v3302_v44 }
0x1950   :  { %4867 = vpow2.f32 %v3305_v47 }
0x195d   :  { %v4868_v53 = vpop.eup %4867 }
0x195e   :  { %v3310_v54 = vsel %vm320_vm5, %v4868_v53, 0.0 }
0x197a   :  { %v5545_v49 = vpop.f32.mrf.mxu0 }
0x197b   :  { %v3134_v41 = vadd.f32 %v5533_v16, %v5545_v49 }
0x197c   :  { %v5547_v57 = vpop.f32.mrf.mxu0 }
0x197d   :  { %v3129_v47 = vadd.f32 %v5538_v29, %v5547_v57 }
0x197e   :  { %v3211_v60 = vpop.f32.mrf.mxu0 }
0x197f   :  { %v3293_v46 = vmul.f32 0.35355338, %v3211_v60 }
0x1980   :  { %v4715_v48 = vpop.f32.mrf.mxu0 }
0x1981   :  { %v3295_v52 = vsel %vm320_vm5, %v3293_v46, -inf }
0x1982   :  { %3296 = vmax.xlane.f32.xlu1 %v3295_v52 }
0x1986   :  { %3311 = vadd.xlane.f32.xlu1 %v3310_v54 }
0x1997   :  { %3393 = vrot.lane.b32.xlu1 %v5443_v43, %s4897_s27 }
0x199b   :  { %3554 = vrot.lane.b32.xlu1 %v5446_v45, %s4898_s28 }
0x199f   :  { %3552 = vrot.lane.b32.xlu1 %v5446_v45, %s4899_s29 }
0x1a0b   :  { %v3297_v58 = vpop.xlane.xlu1 %3296 }
0x1a0c   :  { %v3301_v63 = vsub.f32 %v3293_v46, %v3297_v58 }
0x1a0e   :  { %v3303_v1 = vmul.f32 1.442695, %v3301_v63 }
0x1a0f   :  { %v3312_v2 = vpop.xlane.xlu1 %3311 }
0x1a10   :  { %4869 = vpow2.f32 %v3303_v1 }
0x1a11   :  { %4871 = vrcp.f32 %v3312_v2 }
0x1a13   :  { %v3394_v3 = vpop.permute.xlu1 %3393 }
0x1a14   :  { %4727 = vmatpush3.msra.mxu1 %v3394_v3 }
0x1a15   :  { %4736 = vmatprep.subr.mxu1 %v4888_v11 }
0x1a17   :  { %v3555_v56 = vpop.permute.xlu1 %3554 }
0x1a1b   :  { %v3553_v61 = vpop.permute.xlu1 %3552 }
0x1a1d   :  { %v4870_v5 = vpop.eup %4869 }
0x1a1e   :  { %v4872_v23 = vpop.eup %4871  ;;  %v3307_v6 = vsel %vm320_vm5, %v4870_v5, 0.0 }
0x1a1f   :  { %3308 = vadd.xlane.f32.xlu0 %v3307_v6  ;;  %v3316_v7 = vmul.f32 %v4872_v23, %v4868_v53 }
0x1a21   :  { %4729 = vmatmul.mubr.msk.f32.vlgmr.msra.gmra.mxu1 %vm320_vm5, %v3316_v7 }
0x1a22   :  { %4737 = vmatpush3.xpose.msk.msra.mxu1 %vm320_vm5, %v3555_v56  ;;  %4738 = vmatprep.mubr.msk.f32.mxu1 %vm4889_vm4, %v4888_v11 }
0x1a23   :  { %4746 = vmatprep.subr.mxu1 %v4888_v11 }
0x1a25   :  { %4739 = vmatmul.mubr.msk.f32.vlgmr.msra.gmra.mxu1 %vm320_vm5, %v3553_v61 }
0x1a26   :  { %4748 = vmatprep.mubr.msk.f32.mxu1 %vm4889_vm4, %v4888_v11 }
0x1a35   :  { %3317 = vrot.lane.b32.xlu0 %v5446_v45, %s4897_s27 }
0x1a39   :  { %3632 = vrot.lane.b32.xlu0 %v5443_v43, %s4898_s28 }
0x1a3d   :  { %3630 = vrot.lane.b32.xlu0 %v5443_v43, %s4899_s29 }
0x1aa8   :  { %v3309_v22 = vpop.xlane.xlu0 %3308 }
0x1aa9   :  { %4873 = vrcp.f32 %v3309_v22 }
0x1aac   :  { %v3318_v8 = vpop.permute.xlu0 %3317 }
0x1aad   :  { %4722 = vmatpush3.msra.mxu0 %v3318_v8 }
0x1aae   :  { %4731 = vmatprep.subr.mxu0 %v5235_v4 }
0x1ab0   :  { %v3633_v31 = vpop.permute.xlu0 %3632 }
0x1ab6   :  { %v4874_v9 = vpop.eup %4873 }
0x1ab7   :  { %v3314_v24 = vmul.f32 %v4874_v9, %v4870_v5 }
0x1ab9   :  { %4724 = vmatmul.mubr.msk.f32.vlgmr.msra.gmra.mxu0 %vm320_vm5, %v3314_v24 }
0x1aba   :  { %4732 = vmatpush3.msra.mxu0 %v5235_v4  ;;  %v3631_v4 = vpop.permute.xlu0 %3630 }
0x1abb   :  { %4741 = vmatprep.subr.mxu0 %v4888_v11 }
0x1ae1   :  { %v3465_v25 = vpop.f32.mrf.mxu1 }
0x1ae3   :  { %v4730_v26 = vpop.f32.mrf.mxu1 }
0x1ae5   :  { %v3626_v0 = vpop.f32.mrf.mxu1 }
0x1ae6   :  { %v3708_v27 = vmul.f32 0.35355338, %v3626_v0 }
0x1ae7   :  { %v4740_v10 = vpop.f32.mrf.mxu1 }
0x1ae8   :  { %v3710_v28 = vsel %vm320_vm5, %v3708_v27, -inf }
0x1ae9   :  { %3711 = vmax.xlane.f32.xlu1 %v3710_v28 }
0x1b72   :  { %v3712_v33 = vpop.xlane.xlu1 %3711 }
0x1b73   :  { %v3716_v35 = vsub.f32 %v3708_v27, %v3712_v33 }
0x1b75   :  { %v3718_v40 = vmul.f32 1.442695, %v3716_v35 }
0x1b77   :  { %4875 = vpow2.f32 %v3718_v40 }
0x1b79   :  { %v3389_v30 = vpop.f32.mrf.mxu0 }
0x1b7a   :  { %4733 = vmatprep.mubr.msk.f32.mxu0 %vm320_vm5, %v3389_v30 }
0x1b7b   :  { %v4725_v32 = vpop.f32.mrf.mxu0  ;;  %4734 = vmatmul.mubr.msk.f32.vlgmr.msra.gmra.mxu0 %vm320_vm5, %v3465_v25 }
0x1b7c   :  { %4742 = vmatpush3.xpose.msk.msra.mxu0 %vm320_vm5, %v3633_v31  ;;  %4743 = vmatprep.mubr.msk.f32.mxu0 %vm4889_vm4, %v4888_v11 }
0x1b7d   :  { %4751 = vmatprep.subr.mxu0 %v4888_v11 }
0x1b7f   :  { %4744 = vmatmul.mubr.msk.f32.vlgmr.msra.gmra.mxu0 %vm320_vm5, %v3631_v4 }
0x1b80   :  { %4753 = vmatprep.mubr.msk.f32.mxu0 %vm4889_vm4, %v4888_v11 }
0x1b84   :  { %v4876_v58 = vpop.eup %4875 }
0x1b85   :  { %v3722_v63 = vsel %vm320_vm5, %v4876_v58, 0.0 }
0x1c3b   :  { %v4735_v44 = vpop.f32.mrf.mxu0 }
0x1c3c   :  { %v5591_v60 = vadd.f32 %v4735_v44, %v3134_v41 }
0x1c3d   :  { %v3541_v46 = vpop.f32.mrf.mxu0 }
0x1c3e   :  { %v5593_v48 = vadd.f32 %v3541_v46, %v3129_v47 }
0x1c3f   :  { %v3704_v52 = vpop.f32.mrf.mxu0 }
0x1c40   :  { %v3709_v53 = vmul.f32 0.35355338, %v3704_v52 }
0x1c41   :  { %v4745_v54 = vpop.f32.mrf.mxu0 }
0x1c42   :  { %v3713_v11 = vsel %vm320_vm5, %v3709_v53, -inf }
0x1c43   :  { %3714 = vmax.xlane.f32.xlu0 %v3713_v11 }
0x1c47   :  { %3723 = vadd.xlane.f32.xlu0 %v3722_v63 }
0x1c5d   :  { %3732 = vrot.lane.b32.xlu0 %v5446_v45, %s4900_s0 }
0x1ccc   :  { %v3715_v16 = vpop.xlane.xlu0 %3714 }
0x1ccd   :  { %v3717_v29 = vsub.f32 %v3709_v53, %v3715_v16 }
0x1ccf   :  { %v3720_v49 = vmul.f32 1.442695, %v3717_v29 }
0x1cd0   :  { %v3724_v57 = vpop.xlane.xlu0 %3723 }
0x1cd1   :  { %4877 = vpow2.f32 %v3720_v49 }
0x1cd2   :  { %4879 = vrcp.f32 %v3724_v57 }
0x1cd4   :  { %v3733_v1 = vpop.permute.xlu0 %3732 }
0x1cd5   :  { %4747 = vmatpush3.msra.mxu1 %v3733_v1 }
0x1cd6   :  { %4756 = vmatprep.subr.mxu1 %v5264_v59 }
0x1cde   :  { %v4878_v2 = vpop.eup %4877 }
0x1cdf   :  { %v4880_v3 = vpop.eup %4879  ;;  %v3725_v5 = vsel %vm320_vm5, %v4878_v2, 0.0 }
0x1ce0   :  { %3726 = vadd.xlane.f32.xlu1 %v3725_v5  ;;  %v3729_v23 = vmul.f32 %v4880_v3, %v4876_v58 }
0x1ce2   :  { %4749 = vmatmul.mubr.msk.f32.vlgmr.msra.gmra.mxu1 %vm320_vm5, %v3729_v23 }
0x1ce3   :  { %4757 = vmatpush3.msra.mxu1 %v5264_v59 }
0x1ce4   :  { %4772 = vmatprep.subr.mxu1 %v5323_v17 }
0x1cf1   :  { %3808 = vrot.lane.b32.xlu1 %v5443_v43, %s4900_s0 }
0x1d69   :  { %v3727_v45 = vpop.xlane.xlu1 %3726 }
0x1d6a   :  { %4881 = vrcp.f32 %v3727_v45 }
0x1d6d   :  { %v3809_v56 = vpop.permute.xlu1 %3808 }
0x1d6e   :  { %4752 = vmatpush3.msra.mxu0 %v3809_v56 }
0x1d6f   :  { %4761 = vmatprep.subr.mxu0 %v5295_v12 }
0x1d77   :  { %v4882_v6 = vpop.eup %4881 }
0x1d78   :  { %v3731_v7 = vmul.f32 %v4882_v6, %v4878_v2 }
0x1d7a   :  { %4754 = vmatmul.mubr.msk.f32.vlgmr.msra.gmra.mxu0 %vm320_vm5, %v3731_v7 }
0x1d7b   :  { %4762 = vmatpush3.msra.mxu0 %v5295_v12 }
0x1d7c   :  { %4763 = vmatprep.subr.mxu0 %v5300_v13 }
0x1d7d   :  { %4764 = vmatpush3.msra.mxu0 %v5300_v13 }
0x1d7e   :  { %4765 = vmatprep.subr.mxu0 %v5307_v14 }
0x1d7f   :  { %4766 = vmatpush3.msra.mxu0 %v5307_v14 }
0x1d80   :  { %4767 = vmatprep.subr.mxu0 %v5314_v15 }
0x1d81   :  { %4768 = vmatpush3.msra.mxu0 %v5314_v15 }
0x1da2   :  { %v3804_v59 = vpop.f32.mrf.mxu1 }
0x1da3   :  { %4758 = vmatprep.mubr.msk.f32.mxu1 %vm320_vm5, %v3804_v59 }
0x1da4   :  { %v4750_v43 = vpop.f32.mrf.mxu1 }
0x1e3a   :  { %v3880_v61 = vpop.f32.mrf.mxu0 }
0x1e3b   :  { %4759 = vmatmul.mubr.msk.f32.vlgmr.msra.gmra.mxu1 %vm320_vm5, %v3880_v61 }
0x1e3c   :  { %v4755_v12 = vpop.f32.mrf.mxu0  ;;  %4773 = vmatpush3.msra.mxu1 %v5323_v17 }
0x1e3d   :  { %4774 = vmatprep.subr.mxu1 %v5328_v19 }
0x1e3e   :  { %4775 = vmatpush3.msra.mxu1 %v5328_v19 }
0x1e3f   :  { %4776 = vmatprep.subr.mxu1 %v5336_v20 }
0x1e40   :  { %4777 = vmatpush3.msra.mxu1 %v5336_v20 }
0x1e41   :  { %4778 = vmatprep.subr.mxu1 %v5343_v21 }
0x1e42   :  { %4779 = vmatpush3.msra.mxu1 %v5343_v21 }
0x1e43   :  { %4780 = vmatprep.subr.mxu1 %v5376_v42 }
0x1e44   :  { %4781 = vmatpush3.msra.mxu1 %v5376_v42 }
0x1e45   :  { %4782 = vmatprep.subr.mxu1 %v5383_v36 }
0x1e46   :  { %4783 = vmatpush3.msra.mxu1 %v5383_v36 }
0x1e47   :  { %4784 = vmatprep.subr.mxu1 %v5390_v37 }
0x1e48   :  { %4785 = vmatpush3.msra.mxu1 %v5390_v37 }
0x1e49   :  { %4786 = vmatprep.subr.mxu1 %v5395_v38 }
0x1e4a   :  { %4787 = vmatpush3.msra.mxu1 %v5395_v38 }
0x1efb   :  { %v4760_v13 = vpop.f32.mrf.mxu1 }
0x1efc   :  { %v3966_v14 = vadd.f32 %v4760_v13, %v5591_v60 }
0x1efd   :  { %v3956_v15 = vpop.f32.mrf.mxu1 }
0x1efe   :  { %v3968_v17 = vadd.f32 %v5274_v50, %v3966_v14  ;;  %v3965_v19 = vadd.f32 %v3956_v15, %v5593_v48 }
0x1f00   :  { %v3970_v20 = vadd.f32 %v3968_v17, %v5420_v55  ;;  %v3967_v21 = vadd.f32 %v5274_v50, %v3965_v19 }
0x1f02   :  { %v3969_v42 = vadd.f32 %v3967_v21, %v5424_v62  ;;  %v3974_v36 = vsel %vm186_vm3, %v3970_v20, 0.0 }
0x1f03   :  { %3975 = vadd.xlane.f32.xlu0 %v3974_v36 }
0x1f04   :  { %v3971_v37 = vsel %vm186_vm3, %v3969_v42, 0.0 }
0x1f05   :  { %3972 = vadd.xlane.f32.xlu1 %v3971_v37 }
0x1f8c   :  { %v3976_v38 = vpop.xlane.xlu0 %3975 }
0x1f8d   :  { %v3978_v22 = vmul.f32 0.03125, %v3976_v38 }
0x1f8e   :  { %v3973_v8 = vpop.xlane.xlu1 %3972 }
0x1f8f   :  { %v3980_v9 = vsub.f32 %v3970_v20, %v3978_v22  ;;  %v3977_v24 = vmul.f32 0.03125, %v3973_v8 }
0x1f91   :  { %v3979_v25 = vsub.f32 %v3969_v42, %v3977_v24  ;;  %v3982_v26 = vmul.f32 %v3980_v9, %v3980_v9 }
0x1f93   :  { %v3986_v0 = vsel %vm186_vm3, %v3982_v26, 0.0  ;;  %v3981_v55 = vmul.f32 %v3979_v25, %v3979_v25 }
0x1f94   :  { %3987 = vadd.xlane.f32.xlu1 %v3986_v0 }
0x1f95   :  { %v3983_v50 = vsel %vm186_vm3, %v3981_v55, 0.0 }
0x1f96   :  { %3984 = vadd.xlane.f32.xlu0 %v3983_v50 }
0x201d   :  { %v3988_v62 = vpop.xlane.xlu1 %3987 }
0x201e   :  { %v3990_v27 = vmul.f32 0.03125, %v3988_v62 }
0x201f   :  { %v3985_v10 = vpop.xlane.xlu0 %3984 }
0x2020   :  { %v3992_v28 = vadd.f32 1e-05, %v3990_v27  ;;  %v3989_v31 = vmul.f32 0.03125, %v3985_v10 }
0x2022   :  { %4883 = vrsqrt.f32 %v3992_v28  ;;  %v3991_v30 = vadd.f32 1e-05, %v3989_v31 }
0x2024   :  { %4885 = vrsqrt.f32 %v3991_v30 }
0x202f   :  { %v4884_v32 = vpop.eup %4883 }
0x2030   :  { %v3996_v4 = vmul.f32 %v4884_v32, %v3980_v9 }
0x2031   :  { %v4886_v33 = vpop.eup %4885 }
0x2032   :  { %v3995_v35 = vmul.f32 %v4886_v33, %v3979_v25  ;;  %v3998_v40 = vmul.f32 %v5352_v18, %v3996_v4 }
0x2034   :  { %v3997_v41 = vmul.f32 %v5352_v18, %v3995_v35  ;;  %v4000_v47 = vadd.f32 %v5358_v34, %v3998_v40 }
0x2036   :  { %v3999_v44 = vadd.f32 %v5358_v34, %v3997_v41 }
0x2038   :  { %4769 = vmatprep.mubr.msk.f32.mxu0 %vm186_vm3, %v3999_v44 }
0x2039   :  { %4770 = vmatmul.mubr.msk.f32.vlgmr.msra.gmra.mxu0 %vm186_vm3, %v4000_v47 }
0x20f9   :  { %v4771_v60 = vpop.f32.mrf.mxu0 }
0x20fa   :  { %v4079_v46 = vadd.f32 %v4771_v60, %v5405_v39 }
0x20fb   :  { %v4073_v48 = vpop.f32.mrf.mxu0 }
0x20fc   :  { %v4074_v52 = vadd.f32 %v5405_v39, %v4073_v48  ;;  %v4083_v54 = vmax.f32 %v4079_v46, 0.0 }
0x20fe   :  { %v4082_v53 = vmax.f32 %v4074_v52, 0.0 }
0x2100   :  { %4788 = vmatprep.mubr.msk.f32.mxu1 %vm76_vm0, %v4082_v53 }
0x2101   :  { %4789 = vmatmul.mubr.msk.f32.vlgmr.msra.gmra.mxu1 %vm76_vm0, %v4083_v54 }
0x21c1   :  { %v4790_v18 = vpop.f32.mrf.mxu1 }
0x21c2   :  { %v4162_v11 = vadd.f32 %v4790_v18, %v5416_v51 }
0x21c3   :  { %v4156_v16 = vpop.f32.mrf.mxu1 }
0x21c4   :  { %v4166_v34 = vadd.f32 %v4162_v11, %v3970_v20  ;;  %v4157_v29 = vadd.f32 %v5416_v51, %v4156_v16 }
0x21c6   :  { %v4216_v58 = vrot.slane %v4166_v34, 5  ;;  %v4202_v63 = vrot.slane %v4166_v34, 1  ;;  %v4206_v49 = vrot.slane %v4166_v34, 2  ;;  %v4220_v39 = vrot.slane %v4166_v34, 6 }
0x21c7   :  { %v4165_v57 = vadd.f32 %v4157_v29, %v3969_v42  ;;  %v4210_v1 = vrot.slane %v4166_v34, 3  ;;  %v4224_v2 = vrot.slane %v4166_v34, 7  ;;  %v4214_v15 = vrot.slane %v4166_v34, 4 }
0x21c8   :  { %4217 = vrot.lane.b32.xlu1 %v4216_v58, %s4901_s12  ;;  %4203 = vrot.lane.b32.xlu0 %v4202_v63, %s4901_s12 }
0x21c9   :  { %v4182_v3 = vrot.slane %v4165_v57, 5  ;;  %v4168_v5 = vrot.slane %v4165_v57, 1  ;;  %v4186_v23 = vrot.slane %v4165_v57, 6  ;;  %v4172_v45 = vrot.slane %v4165_v57, 2 }
0x21ca   :  { %v4190_v51 = vrot.slane %v4165_v57, 7  ;;  %v4176_v56 = vrot.slane %v4165_v57, 3  ;;  %v4180_v22 = vrot.slane %v4165_v57, 4 }
0x21cc   :  { %4207 = vrot.lane.b32.xlu1 %v4206_v49, %s4891_s6  ;;  %4221 = vrot.lane.b32.xlu0 %v4220_v39, %s4891_s6 }
0x21d0   :  { %4211 = vrot.lane.b32.xlu1 %v4210_v1, %s4890_s19  ;;  %4225 = vrot.lane.b32.xlu0 %v4224_v2, %s4890_s19 }
0x21d4   :  { %4183 = vrot.lane.b32.xlu0 %v4182_v3, %s4901_s12  ;;  %4169 = vrot.lane.b32.xlu1 %v4168_v5, %s4901_s12 }
0x21d8   :  { %4187 = vrot.lane.b32.xlu0 %v4186_v23, %s4891_s6  ;;  %4173 = vrot.lane.b32.xlu1 %v4172_v45, %s4891_s6 }
0x21dc   :  { %4191 = vrot.lane.b32.xlu0 %v4190_v51, %s4890_s19  ;;  %4177 = vrot.lane.b32.xlu1 %v4176_v56, %s4890_s19 }
0x223a   :  { %v4218_v6 = vpop.permute.xlu1 %4217  ;;  %v4204_v7 = vpop.permute.xlu0 %4203 }
0x223b   :  { %v4231_v17 = vsel %vm186_vm3, %v4214_v15, %v4218_v6  ;;  %v4228_v19 = vsel %vm186_vm3, %v4166_v34, %v4204_v7 }
0x223e   :  { %v4208_v59 = vpop.permute.xlu1 %4207  ;;  %v4222_v43 = vpop.permute.xlu0 %4221 }
0x223f   :  { %v4229_v20 = vsel %vm76_vm0, %v4228_v19, %v4208_v59  ;;  %v4232_v21 = vsel %vm76_vm0, %v4231_v17, %v4222_v43 }
0x2242   :  { %v4212_v61 = vpop.permute.xlu1 %4211  ;;  %v4226_v12 = vpop.permute.xlu0 %4225 }
0x2243   :  { %v4230_v37 = vsel %vm4196_vm6, %v4229_v20, %v4212_v61  ;;  %v4233_v38 = vsel %vm4196_vm6, %v4232_v21, %v4226_v12 }
0x2244   :  { %v4236_v24 = vrot.slane %v4230_v37, 7  ;;  %v4237_v25 = vrot.slane %v4233_v38, 7 }
0x2246   :  { %v4184_v13 = vpop.permute.xlu0 %4183  ;;  %v4170_v14 = vpop.permute.xlu1 %4169 }
0x2247   :  { %v4198_v8 = vsel %vm186_vm3, %v4180_v22, %v4184_v13  ;;  %v4194_v9 = vsel %vm186_vm3, %v4165_v57, %v4170_v14 }
0x224a   :  { %v4188_v42 = vpop.permute.xlu0 %4187  ;;  %v4174_v36 = vpop.permute.xlu1 %4173 }
0x224b   :  { %v4199_v26 = vsel %vm76_vm0, %v4198_v8, %v4188_v42  ;;  %v4195_v0 = vsel %vm76_vm0, %v4194_v9, %v4174_v36 }
0x224e   :  { %v4192_v55 = vpop.permute.xlu0 %4191  ;;  %v4178_v50 = vpop.permute.xlu1 %4177 }
0x224f   :  { %v4200_v62 = vsel %vm4196_vm6, %v4199_v26, %v4192_v55  ;;  %v4197_v27 = vsel %vm4196_vm6, %v4195_v0, %v4178_v50 }
0x2250   :  { %v4242_v10 = vsel %vm4240_vm7, %v4200_v62, %v4237_v25  ;;  %v4241_v28 = vsel %vm4240_vm7, %v4197_v27, %v4236_v24 }
0x2251   :  { %v4245_v31 = vcombine.low %v4241_v28, %v4242_v10 }
0x2253   :  { %4347 = vst.sshfl [vmem:[%s5692_s15] sm:$0x33 pattern:$0x76325410] %v4245_v31 }

</bundles_post_ra>
